<compile_context>
chip_gen: v7x
topology: tpu7x:2x2x1
jax: 0.10.0
libtpu: 0.0.40
codegen_flags: <defaults>
</compile_context>

<pallas_src>
import math
from functools import partial

import jax
import jax.numpy as jnp
from jax.experimental import pallas as pl
from jax.experimental.pallas import tpu as pltpu


# 48 MiB: <= v7x physical 64 MiB with headroom; well under v5e/v6e 128 MiB.
_VMEM_LIMIT = 48 * 1024 * 1024
_LN_EPS = 1e-5


def _round_up(x, m):
    return (x + m - 1) // m * m


def _pick_tile(dim, granule, target):
    """Largest tile t <= target with t % granule == 0 and dim % t == 0.
    Falls back to the full dim (block == full extent is always legal)."""
    if dim <= target:
        return dim
    t = (target // granule) * granule
    while t >= granule:
        if dim % t == 0:
            return t
        t -= granule
    return dim


def _row_tile(n, granule=8, target=512):
    # Prefer >= 2 grid steps so both v7x TensorCores get work when possible.
    return _pick_tile(n, granule, min(target, max(granule, n // 2)))


def _layernorm(z, g, b, eps):
    mu = jnp.mean(z, axis=-1, keepdims=True)
    zc = z - mu
    var = jnp.mean(zc * zc, axis=-1, keepdims=True)
    return zc * jax.lax.rsqrt(var + eps) * g + b


# ----------------------------------------------------------------------------
# Tiled linear:  x(N,K) @ w(K,F) + b   — rows x cols x K-chunk grid, f32 acc
# (used for the final vocab projection)
# ----------------------------------------------------------------------------

def _linear_acc_kernel(x_ref, w_ref, b_ref, o_ref, acc_ref):
    @pl.when(pl.program_id(2) == 0)
    def _():
        acc_ref[...] = jnp.zeros_like(acc_ref)

    acc_ref[...] += jnp.dot(
        x_ref[...].astype(jnp.bfloat16), w_ref[...],
        preferred_element_type=jnp.float32)

    @pl.when(pl.program_id(2) == pl.num_programs(2) - 1)
    def _():
        o_ref[...] = (acc_ref[...] + b_ref[...]).astype(o_ref.dtype)


def linear_tiled(x2d, w_bf16, b_f32, out_dtype=jnp.float32):
    N, K = x2d.shape
    F = w_bf16.shape[1]
    tm = _row_tile(N)
    # 1024-targets are 256-aligned when possible (v6e MXU 2x256x256).
    tn = _pick_tile(F, 128, 1024)
    tk = _pick_tile(K, 128, 1024)
    grid = (N // tm, F // tn, K // tk)
    return pl.pallas_call(
        _linear_acc_kernel,
        out_shape=jax.ShapeDtypeStruct((N, F), out_dtype),
        grid=grid,
        in_specs=[
            pl.BlockSpec((tm, tk), lambda i, j, k: (i, k)),
            pl.BlockSpec((tk, tn), lambda i, j, k: (k, j)),
            pl.BlockSpec((1, tn), lambda i, j, k: (0, j)),
        ],
        out_specs=pl.BlockSpec((tm, tn), lambda i, j, k: (i, j)),
        scratch_shapes=[pltpu.VMEM((tm, tn), jnp.float32)],
        compiler_params=pltpu.CompilerParams(
            dimension_semantics=("parallel", "parallel", "arbitrary"),
            vmem_limit_bytes=_VMEM_LIMIT),
    )(x2d, w_bf16, b_f32.reshape(1, F))


# ----------------------------------------------------------------------------
# Head-batched attention math (no per-head loop, no transposes)
#   q/k/v weights arrive head-major: (H, D, dh); Wo head-major: (H, dh, D).
#   Scale 1/sqrt(dh) is folded into wq/bq by the parameter prep.
# ----------------------------------------------------------------------------

def _mha_headmajor(x_q, x_kv, wq, bq, wk, bk, wv, bv, wo, bo):
    Sq, D = x_q.shape
    Sk = x_kv.shape[0]
    H = wq.shape[0]

    xqb = jnp.broadcast_to(x_q, (H, Sq, D))          # bf16
    xkb = jnp.broadcast_to(x_kv, (H, Sk, D))         # bf16

    q = jnp.einsum('hsd,hdf->hsf', xqb, wq,
                   preferred_element_type=jnp.float32) + bq        # (H,Sq,dh)
    k = jnp.einsum('hsd,hdf->hsf', xkb, wk,
                   preferred_element_type=jnp.float32) + bk        # (H,Sk,dh)
    v = jnp.einsum('hsd,hdf->hsf', xkb, wv,
                   preferred_element_type=jnp.float32) + bv        # (H,Sk,dh)

    s = jnp.einsum('hqd,hkd->hqk', q.astype(jnp.bfloat16), k.astype(jnp.bfloat16),
                   preferred_element_type=jnp.float32)             # (H,Sq,Sk)
    m = jnp.max(s, axis=-1, keepdims=True)
    p = jnp.exp(s - m)
    p = p * pl.reciprocal(jnp.sum(p, axis=-1, keepdims=True), approx=True)

    o = jnp.einsum('hqk,hkd->hqd', p.astype(jnp.bfloat16), v.astype(jnp.bfloat16),
                   preferred_element_type=jnp.float32)             # (H,Sq,dh)

    # Output projection with the head-merge folded into Wo's layout.
    ph = jnp.einsum('hqd,hdf->hqf', o.astype(jnp.bfloat16), wo,
                    preferred_element_type=jnp.float32)            # (H,Sq,D)
    return jnp.sum(ph, axis=0) + bo                                # (Sq,D) f32


# ----------------------------------------------------------------------------
# Fused sublayer kernels (one pallas_call per sublayer)
# ----------------------------------------------------------------------------

def _self_attn_ln_kernel(x_ref, wq_ref, bq_ref, wk_ref, bk_ref, wv_ref, bv_ref,
                         wo_ref, bo_ref, g_ref, b_ref, o_ref, *, eps):
    x = x_ref[0]                                                   # (S, D) bf16
    proj = _mha_headmajor(x, x, wq_ref[...], bq_ref[...], wk_ref[...],
                          bk_ref[...], wv_ref[...], bv_ref[...],
                          wo_ref[...], bo_ref[...])
    z = x.astype(jnp.float32) + proj
    o_ref[0] = _layernorm(z, g_ref[...], b_ref[...], eps).astype(o_ref.dtype)


def _cross_attn_ln_kernel(x_ref, enc_ref, wq_ref, bq_ref, wk_ref, bk_ref,
                          wv_ref, bv_ref, wo_ref, bo_ref, g_ref, b_ref, o_ref,
                          *, eps):
    x = x_ref[0]                                                   # (Sq, D) bf16
    e = enc_ref[0]                                                 # (Sk, D) bf16
    proj = _mha_headmajor(x, e, wq_ref[...], bq_ref[...], wk_ref[...],
                          bk_ref[...], wv_ref[...], bv_ref[...],
                          wo_ref[...], bo_ref[...])
    z = x.astype(jnp.float32) + proj
    o_ref[0] = _layernorm(z, g_ref[...], b_ref[...], eps).astype(o_ref.dtype)


def _ffn_add_ln_kernel(x_ref, w1_ref, b1_ref, w2_ref, b2_ref, g_ref, b_ref,
                       o_ref, *, eps):
    x = x_ref[...]                                                 # (tm, D) bf16
    h = jnp.dot(x, w1_ref[...], preferred_element_type=jnp.float32) + b1_ref[...]
    h = jnp.maximum(h, 0.0)
    f = jnp.dot(h.astype(jnp.bfloat16), w2_ref[...],
                preferred_element_type=jnp.float32) + b2_ref[...]
    z = x.astype(jnp.float32) + f
    o_ref[...] = _layernorm(z, g_ref[...], b_ref[...], eps).astype(o_ref.dtype)


def self_attn_sublayer(x, p, eps=_LN_EPS):
    B, S, D = x.shape
    H, _, dh = p["wq3"].shape
    row = pl.BlockSpec((1, S, D), lambda b: (b, 0, 0))
    w_in = pl.BlockSpec((H, D, dh), lambda b: (0, 0, 0))
    b_in = pl.BlockSpec((H, 1, dh), lambda b: (0, 0, 0))
    w_out = pl.BlockSpec((H, dh, D), lambda b: (0, 0, 0))
    vec = pl.BlockSpec((1, D), lambda b: (0, 0))
    return pl.pallas_call(
        partial(_self_attn_ln_kernel, eps=eps),
        out_shape=jax.ShapeDtypeStruct((B, S, D), jnp.bfloat16),
        grid=(B,),
        in_specs=[row, w_in, b_in, w_in, b_in, w_in, b_in, w_out, vec, vec, vec],
        out_specs=row,
        compiler_params=pltpu.CompilerParams(
            dimension_semantics=("parallel",), vmem_limit_bytes=_VMEM_LIMIT),
    )(x, p["wq3"], p["bq3"], p["wk3"], p["bk3"], p["wv3"], p["bv3"],
      p["wo3"], p["bo"], p["gamma"], p["beta"])


def cross_attn_sublayer(x, enc, p, eps=_LN_EPS):
    B, Sq, D = x.shape
    Sk = enc.shape[1]
    H, _, dh = p["wq3"].shape
    rowq = pl.BlockSpec((1, Sq, D), lambda b: (b, 0, 0))
    rowk = pl.BlockSpec((1, Sk, D), lambda b: (b, 0, 0))
    w_in = pl.BlockSpec((H, D, dh), lambda b: (0, 0, 0))
    b_in = pl.BlockSpec((H, 1, dh), lambda b: (0, 0, 0))
    w_out = pl.BlockSpec((H, dh, D), lambda b: (0, 0, 0))
    vec = pl.BlockSpec((1, D), lambda b: (0, 0))
    return pl.pallas_call(
        partial(_cross_attn_ln_kernel, eps=eps),
        out_shape=jax.ShapeDtypeStruct((B, Sq, D), jnp.bfloat16),
        grid=(B,),
        in_specs=[rowq, rowk, w_in, b_in, w_in, b_in, w_in, b_in, w_out,
                  vec, vec, vec],
        out_specs=rowq,
        compiler_params=pltpu.CompilerParams(
            dimension_semantics=("parallel",), vmem_limit_bytes=_VMEM_LIMIT),
    )(x, enc, p["wq3"], p["bq3"], p["wk3"], p["bk3"], p["wv3"], p["bv3"],
      p["wo3"], p["bo"], p["gamma"], p["beta"])


def ffn_sublayer(x, p, eps=_LN_EPS):
    # TODO(synk): for large d_model/d_ff (e.g. 4096/16384) the resident weight
    # blocks exceed v7x's 64 MiB VMEM; fall back to linear_tiled + separate
    # add+LN kernel, or K/N-tile the weights inside this kernel.
    B, S, D = x.shape
    F = p["w1"].shape[1]
    x2d = x.reshape(-1, D)
    N = x2d.shape[0]
    tm = _row_tile(N)
    row = pl.BlockSpec((tm, D), lambda i: (i, 0))
    vec = pl.BlockSpec((1, D), lambda i: (0, 0))
    out = pl.pallas_call(
        partial(_ffn_add_ln_kernel, eps=eps),
        out_shape=jax.ShapeDtypeStruct((N, D), jnp.bfloat16),
        grid=(N // tm,),
        in_specs=[
            row,
            pl.BlockSpec((D, F), lambda i: (0, 0)),
            pl.BlockSpec((1, F), lambda i: (0, 0)),
            pl.BlockSpec((F, D), lambda i: (0, 0)),
            vec, vec, vec,
        ],
        out_specs=row,
        compiler_params=pltpu.CompilerParams(
            dimension_semantics=("parallel",), vmem_limit_bytes=_VMEM_LIMIT),
    )(x2d, p["w1"], p["b1"], p["w2"], p["b2"], p["gamma"], p["beta"])
    return out.reshape(B, S, D)


# ----------------------------------------------------------------------------
# Model glue
# ----------------------------------------------------------------------------

def positional_encoding(max_seq_len, d_model):
    pos = jnp.arange(max_seq_len, dtype=jnp.float32)[:, None]
    i = jnp.arange(d_model, dtype=jnp.float32)[None, :]
    angle_rates = 1.0 / jnp.power(10000.0, 2.0 * jnp.floor(i / 2.0) / d_model)
    angle_rads = pos * angle_rates
    pe = jnp.where(jnp.arange(d_model) % 2 == 0,
                   jnp.sin(angle_rads), jnp.cos(angle_rads))
    return pe[None, :, :]  # (1, max_seq_len, d_model)


def transformer_forward(params, input_seq, target_seq, *, vocab_size):
    emb = params["embedding"]
    D = emb.shape[1]

    # TODO(synk): embedding gather kept as jnp.take (dynamic gather; not a
    # clean Pallas BlockSpec pattern at this scale).
    x = jnp.take(emb, input_seq, axis=0)                 # (B, S, D) f32
    S = x.shape[1]
    x = (x + params["pos_enc"][:, :S, :]).astype(jnp.bfloat16)
    for lp in params["enc_layers"]:
        x = self_attn_sublayer(x, lp["attn"])
        x = ffn_sublayer(x, lp["ffn"])
    enc_output = x

    y = jnp.take(emb, target_seq, axis=0)
    St = y.shape[1]
    y = (y + params["pos_enc"][:, :St, :]).astype(jnp.bfloat16)
    dec = params["decoder"]
    y = self_attn_sublayer(y, dec["self"])               # no causal mask (ref)
    y = cross_attn_sublayer(y, enc_output, dec["cross"])
    y = ffn_sublayer(y, dec["ffn"])

    B = y.shape[0]
    logits = linear_tiled(y.reshape(-1, D), params["out_w"], params["out_b"],
                          out_dtype=jnp.float32)
    logits = logits[:, :vocab_size]                      # drop padded vocab lanes
    return logits.reshape(B, St, vocab_size)


# ----------------------------------------------------------------------------
# Deterministic parameter init
#   - attention weights stored head-major ((H,D,dh) / (H,dh,D)), bf16
#   - 1/sqrt(dh) folded into Wq/bq
#   - biases / LN / embeddings f32
# ----------------------------------------------------------------------------

def init_params(key, d_model, num_heads, num_layers, d_ff, vocab_size, max_seq_len):
    def nrm(k, shape, scale=0.02):
        return scale * jax.random.normal(k, shape, dtype=jnp.float32)

    keys = iter(jax.random.split(key, 512))
    dh = d_model // num_heads
    q_scale = 1.0 / math.sqrt(dh)

    def head_major_in(w, s=1.0):
        # (D, D) -> (D, H, dh) -> (H, D, dh)
        return (w * s).reshape(d_model, num_heads, dh).transpose(1, 0, 2) \
                      .astype(jnp.bfloat16)

    def mha_params():
        return {
            "wq3": head_major_in(nrm(next(keys), (d_model, d_model)), q_scale),
            "bq3": jnp.zeros((num_heads, 1, dh), jnp.float32),
            "wk3": head_major_in(nrm(next(keys), (d_model, d_model))),
            "bk3": jnp.zeros((num_heads, 1, dh), jnp.float32),
            "wv3": head_major_in(nrm(next(keys), (d_model, d_model))),
            "bv3": jnp.zeros((num_heads, 1, dh), jnp.float32),
            # (D, D) -> (H, dh, D): head-merge folded into Wo layout
            "wo3": nrm(next(keys), (d_model, d_model))
                   .reshape(num_heads, dh, d_model).astype(jnp.bfloat16),
            "bo": jnp.zeros((1, d_model), jnp.float32),
            "gamma": jnp.ones((1, d_model), jnp.float32),
            "beta": jnp.zeros((1, d_model), jnp.float32),
        }

    def ffn_params():
        return {
            "w1": nrm(next(keys), (d_model, d_ff)).astype(jnp.bfloat16),
            "b1": jnp.zeros((1, d_ff), jnp.float32),
            "w2": nrm(next(keys), (d_ff, d_model)).astype(jnp.bfloat16),
            "b2": jnp.zeros((1, d_model), jnp.float32),
            "gamma": jnp.ones((1, d_model), jnp.float32),
            "beta": jnp.zeros((1, d_model), jnp.float32),
        }

    enc_layers = [{"attn": mha_params(), "ffn": ffn_params()}
                  for _ in range(num_layers)]
    decoder = {"self": mha_params(), "cross": mha_params(), "ffn": ffn_params()}

    vocab_pad = _round_up(vocab_size, 128)               # lane-dense stores
    out_w = nrm(next(keys), (d_model, vocab_size))
    out_w = jnp.pad(out_w, ((0, 0), (0, vocab_pad - vocab_size))).astype(jnp.bfloat16)

    return {
        "embedding": nrm(next(keys), (vocab_size, d_model), scale=1.0),
        "pos_enc": positional_encoding(max_seq_len, d_model),
        "enc_layers": enc_layers,
        "decoder": decoder,
        "out_w": out_w,
        "out_b": jnp.zeros((vocab_pad,), jnp.float32),
    }


# ----------------------------------------------------------------------------
# Main
# ----------------------------------------------------------------------------

if __name__ == "__main__":
    d_model = 32
    num_heads = 4
    num_layers = 2
    d_ff = 64
    vocab_size = 50
    max_seq_len = 16

    batch = 2
    seq_len = 8

    key = jax.random.PRNGKey(0)
    k_params, k_in, k_tgt = jax.random.split(key, 3)

    params = init_params(k_params, d_model, num_heads, num_layers,
                         d_ff, vocab_size, max_seq_len)

    input_seq = jax.random.randint(k_in, (batch, seq_len), 0, vocab_size,
                                   dtype=jnp.int32)
    target_seq = jax.random.randint(k_tgt, (batch, seq_len), 0, vocab_size,
                                    dtype=jnp.int32)

    fwd = jax.jit(partial(transformer_forward, vocab_size=vocab_size))
    logits = fwd(params, input_seq, target_seq)
    jax.block_until_ready(logits)

    assert logits.shape == (batch, seq_len, vocab_size), logits.shape
    assert jnp.all(jnp.isfinite(logits))
    print("KERNEL_OK")
</pallas_src>

<mosaic_0001>
module attributes {stable_mosaic.version = 11 : i64} {
  func.func @_self_attn_ln_kernel(%arg0: i32, %arg1: memref<1x8x32xbf16, #tpu.memory_space<vmem>>, %arg2: memref<4x32x8xbf16, #tpu.memory_space<vmem>>, %arg3: memref<4x1x8xf32, #tpu.memory_space<vmem>>, %arg4: memref<4x32x8xbf16, #tpu.memory_space<vmem>>, %arg5: memref<4x1x8xf32, #tpu.memory_space<vmem>>, %arg6: memref<4x32x8xbf16, #tpu.memory_space<vmem>>, %arg7: memref<4x1x8xf32, #tpu.memory_space<vmem>>, %arg8: memref<4x8x32xbf16, #tpu.memory_space<vmem>>, %arg9: memref<1x32xf32, #tpu.memory_space<vmem>>, %arg10: memref<1x32xf32, #tpu.memory_space<vmem>>, %arg11: memref<1x32xf32, #tpu.memory_space<vmem>>, %arg12: memref<1x8x32xbf16, #tpu.memory_space<vmem>>) attributes {dimension_semantics = [#tpu.dimension_semantics<parallel>], iteration_bounds = array<i64: 2>, scalar_prefetch = 0 : i64, scratch_operands = 0 : i64, tpu.core_type = #tpu.core_type<tc>, window_params = [{transform_indices = @transform_0, window_bounds = array<i64: 1, 8, 32>}, {pipeline_mode = #tpu.pipeline_mode<synchronous>, transform_indices = @transform_1, window_bounds = array<i64: 4, 32, 8>}, {pipeline_mode = #tpu.pipeline_mode<synchronous>, transform_indices = @transform_2, window_bounds = array<i64: 4, 1, 8>}, {pipeline_mode = #tpu.pipeline_mode<synchronous>, transform_indices = @transform_3, window_bounds = array<i64: 4, 32, 8>}, {pipeline_mode = #tpu.pipeline_mode<synchronous>, transform_indices = @transform_4, window_bounds = array<i64: 4, 1, 8>}, {pipeline_mode = #tpu.pipeline_mode<synchronous>, transform_indices = @transform_5, window_bounds = array<i64: 4, 32, 8>}, {pipeline_mode = #tpu.pipeline_mode<synchronous>, transform_indices = @transform_6, window_bounds = array<i64: 4, 1, 8>}, {pipeline_mode = #tpu.pipeline_mode<synchronous>, transform_indices = @transform_7, window_bounds = array<i64: 4, 8, 32>}, {pipeline_mode = #tpu.pipeline_mode<synchronous>, transform_indices = @transform_8, window_bounds = array<i64: 1, 32>}, {pipeline_mode = #tpu.pipeline_mode<synchronous>, transform_indices = @transform_9, window_bounds = array<i64: 1, 32>}, {pipeline_mode = #tpu.pipeline_mode<synchronous>, transform_indices = @transform_10, window_bounds = array<i64: 1, 32>}, {transform_indices = @transform_11, window_bounds = array<i64: 1, 8, 32>}]} {
    %c0 = arith.constant 0 : index
    %c0_0 = arith.constant 0 : index
    %c0_1 = arith.constant 0 : index
    %0 = vector.load %arg1[%c0, %c0_0, %c0_1] : memref<1x8x32xbf16, #tpu.memory_space<vmem>>, vector<1x8x32xbf16>
    %1 = vector.shape_cast %0 : vector<1x8x32xbf16> to vector<8x32xbf16>
    %c0_2 = arith.constant 0 : index
    %c0_3 = arith.constant 0 : index
    %c0_4 = arith.constant 0 : index
    %2 = vector.load %arg2[%c0_2, %c0_3, %c0_4] : memref<4x32x8xbf16, #tpu.memory_space<vmem>>, vector<4x32x8xbf16>
    %c0_5 = arith.constant 0 : index
    %c0_6 = arith.constant 0 : index
    %c0_7 = arith.constant 0 : index
    %3 = vector.load %arg3[%c0_5, %c0_6, %c0_7] : memref<4x1x8xf32, #tpu.memory_space<vmem>>, vector<4x1x8xf32>
    %c0_8 = arith.constant 0 : index
    %c0_9 = arith.constant 0 : index
    %c0_10 = arith.constant 0 : index
    %4 = vector.load %arg4[%c0_8, %c0_9, %c0_10] : memref<4x32x8xbf16, #tpu.memory_space<vmem>>, vector<4x32x8xbf16>
    %c0_11 = arith.constant 0 : index
    %c0_12 = arith.constant 0 : index
    %c0_13 = arith.constant 0 : index
    %5 = vector.load %arg5[%c0_11, %c0_12, %c0_13] : memref<4x1x8xf32, #tpu.memory_space<vmem>>, vector<4x1x8xf32>
    %c0_14 = arith.constant 0 : index
    %c0_15 = arith.constant 0 : index
    %c0_16 = arith.constant 0 : index
    %6 = vector.load %arg6[%c0_14, %c0_15, %c0_16] : memref<4x32x8xbf16, #tpu.memory_space<vmem>>, vector<4x32x8xbf16>
    %c0_17 = arith.constant 0 : index
    %c0_18 = arith.constant 0 : index
    %c0_19 = arith.constant 0 : index
    %7 = vector.load %arg7[%c0_17, %c0_18, %c0_19] : memref<4x1x8xf32, #tpu.memory_space<vmem>>, vector<4x1x8xf32>
    %c0_20 = arith.constant 0 : index
    %c0_21 = arith.constant 0 : index
    %c0_22 = arith.constant 0 : index
    %8 = vector.load %arg8[%c0_20, %c0_21, %c0_22] : memref<4x8x32xbf16, #tpu.memory_space<vmem>>, vector<4x8x32xbf16>
    %c0_23 = arith.constant 0 : index
    %c0_24 = arith.constant 0 : index
    %9 = vector.load %arg9[%c0_23, %c0_24] : memref<1x32xf32, #tpu.memory_space<vmem>>, vector<1x32xf32>
    %10 = vector.shape_cast %1 : vector<8x32xbf16> to vector<1x8x32xbf16>
    %11 = vector.broadcast %10 : vector<1x8x32xbf16> to vector<4x8x32xbf16>
    %12 = vector.shape_cast %1 : vector<8x32xbf16> to vector<1x8x32xbf16>
    %13 = vector.broadcast %12 : vector<1x8x32xbf16> to vector<4x8x32xbf16>
    "tpu.trace_start"() <{level = 10 : i32, message = "hsd,hdf->hsf"}> : () -> ()
    %cst = arith.constant dense<0.000000e+00> : vector<4x8x8xf32>
    %14 = tpu.matmul %11, %2, %cst {dimension_numbers = #tpu.dot_dimension_numbers<[2], [1], [1], [2], [0, 0, 0, 1, 1, 2], [0], [0]>} : vector<4x8x32xbf16>, vector<4x32x8xbf16>, vector<4x8x8xf32> -> vector<4x8x8xf32>
    "tpu.trace_stop"() : () -> ()
    %15 = vector.broadcast %3 : vector<4x1x8xf32> to vector<4x8x8xf32>
    %16 = arith.addf %14, %15 : vector<4x8x8xf32>
    "tpu.trace_start"() <{level = 10 : i32, message = "hsd,hdf->hsf"}> : () -> ()
    %cst_25 = arith.constant dense<0.000000e+00> : vector<4x8x8xf32>
    %17 = tpu.matmul %13, %4, %cst_25 {dimension_numbers = #tpu.dot_dimension_numbers<[2], [1], [1], [2], [0, 0, 0, 1, 1, 2], [0], [0]>} : vector<4x8x32xbf16>, vector<4x32x8xbf16>, vector<4x8x8xf32> -> vector<4x8x8xf32>
    "tpu.trace_stop"() : () -> ()
    %18 = vector.broadcast %5 : vector<4x1x8xf32> to vector<4x8x8xf32>
    %19 = arith.addf %17, %18 : vector<4x8x8xf32>
    "tpu.trace_start"() <{level = 10 : i32, message = "hsd,hdf->hsf"}> : () -> ()
    %cst_26 = arith.constant dense<0.000000e+00> : vector<4x8x8xf32>
    %20 = tpu.matmul %13, %6, %cst_26 {dimension_numbers = #tpu.dot_dimension_numbers<[2], [1], [1], [2], [0, 0, 0, 1, 1, 2], [0], [0]>} : vector<4x8x32xbf16>, vector<4x32x8xbf16>, vector<4x8x8xf32> -> vector<4x8x8xf32>
    "tpu.trace_stop"() : () -> ()
    %21 = vector.broadcast %7 : vector<4x1x8xf32> to vector<4x8x8xf32>
    %22 = arith.addf %20, %21 : vector<4x8x8xf32>
    %23 = arith.truncf %16 : vector<4x8x8xf32> to vector<4x8x8xbf16>
    %24 = arith.truncf %19 : vector<4x8x8xf32> to vector<4x8x8xbf16>
    "tpu.trace_start"() <{level = 10 : i32, message = "hqd,hkd->hqk"}> : () -> ()
    %cst_27 = arith.constant dense<0.000000e+00> : vector<4x8x8xf32>
    %25 = tpu.matmul %23, %24, %cst_27 {dimension_numbers = #tpu.dot_dimension_numbers<[2], [2], [1], [1], [0, 0, 0, 1, 1, 1], [0], [0]>} : vector<4x8x8xbf16>, vector<4x8x8xbf16>, vector<4x8x8xf32> -> vector<4x8x8xf32>
    "tpu.trace_stop"() : () -> ()
    %cst_28 = arith.constant dense<0xFF800000> : vector<4x8xf32>
    %26 = vector.multi_reduction <maximumf>, %25, %cst_28 [2] : vector<4x8x8xf32> to vector<4x8xf32>
    %27 = vector.shape_cast %26 : vector<4x8xf32> to vector<4x8x1xf32>
    %28 = vector.broadcast %27 : vector<4x8x1xf32> to vector<4x8x8xf32>
    %29 = arith.subf %25, %28 : vector<4x8x8xf32>
    %30 = math.exp %29 : vector<4x8x8xf32>
    %cst_29 = arith.constant dense<0.000000e+00> : vector<4x8xf32>
    %31 = vector.multi_reduction <add>, %30, %cst_29 [2] : vector<4x8x8xf32> to vector<4x8xf32>
    %32 = vector.shape_cast %31 : vector<4x8xf32> to vector<4x8x1xf32>
    %33 = tpu.reciprocal %32 {approx = true} : vector<4x8x1xf32> -> vector<4x8x1xf32>
    %34 = vector.broadcast %33 : vector<4x8x1xf32> to vector<4x8x8xf32>
    %35 = arith.mulf %30, %34 : vector<4x8x8xf32>
    %36 = arith.truncf %35 : vector<4x8x8xf32> to vector<4x8x8xbf16>
    %37 = arith.truncf %22 : vector<4x8x8xf32> to vector<4x8x8xbf16>
    "tpu.trace_start"() <{level = 10 : i32, message = "hqk,hkd->hqd"}> : () -> ()
    %cst_30 = arith.constant dense<0.000000e+00> : vector<4x8x8xf32>
    %38 = tpu.matmul %36, %37, %cst_30 {dimension_numbers = #tpu.dot_dimension_numbers<[2], [1], [1], [2], [0, 0, 0, 1, 1, 2], [0], [0]>} : vector<4x8x8xbf16>, vector<4x8x8xbf16>, vector<4x8x8xf32> -> vector<4x8x8xf32>
    "tpu.trace_stop"() : () -> ()
    %39 = arith.truncf %38 : vector<4x8x8xf32> to vector<4x8x8xbf16>
    "tpu.trace_start"() <{level = 10 : i32, message = "hqd,hdf->hqf"}> : () -> ()
    %cst_31 = arith.constant dense<0.000000e+00> : vector<4x8x32xf32>
    %40 = tpu.matmul %39, %8, %cst_31 {dimension_numbers = #tpu.dot_dimension_numbers<[2], [1], [1], [2], [0, 0, 0, 1, 1, 2], [0], [0]>} : vector<4x8x8xbf16>, vector<4x8x32xbf16>, vector<4x8x32xf32> -> vector<4x8x32xf32>
    "tpu.trace_stop"() : () -> ()
    %cst_32 = arith.constant dense<0.000000e+00> : vector<8x32xf32>
    %41 = vector.multi_reduction <add>, %40, %cst_32 [0] : vector<4x8x32xf32> to vector<8x32xf32>
    %42 = vector.broadcast %9 : vector<1x32xf32> to vector<8x32xf32>
    %43 = arith.addf %41, %42 : vector<8x32xf32>
    %44 = arith.extf %1 : vector<8x32xbf16> to vector<8x32xf32>
    %45 = arith.addf %44, %43 : vector<8x32xf32>
    %c0_33 = arith.constant 0 : index
    %c0_34 = arith.constant 0 : index
    %46 = vector.load %arg10[%c0_33, %c0_34] : memref<1x32xf32, #tpu.memory_space<vmem>>, vector<1x32xf32>
    %c0_35 = arith.constant 0 : index
    %c0_36 = arith.constant 0 : index
    %47 = vector.load %arg11[%c0_35, %c0_36] : memref<1x32xf32, #tpu.memory_space<vmem>>, vector<1x32xf32>
    %cst_37 = arith.constant dense<0.000000e+00> : vector<8xf32>
    %48 = vector.multi_reduction <add>, %45, %cst_37 [1] : vector<8x32xf32> to vector<8xf32>
    %49 = vector.shape_cast %48 : vector<8xf32> to vector<8x1xf32>
    %cst_38 = arith.constant 3.200000e+01 : f32
    %50 = vector.broadcast %cst_38 : f32 to vector<8x1xf32>
    %51 = arith.divf %49, %50 : vector<8x1xf32>
    %52 = vector.broadcast %51 : vector<8x1xf32> to vector<8x32xf32>
    %53 = arith.subf %45, %52 : vector<8x32xf32>
    %54 = arith.mulf %53, %53 : vector<8x32xf32>
    %cst_39 = arith.constant dense<0.000000e+00> : vector<8xf32>
    %55 = vector.multi_reduction <add>, %54, %cst_39 [1] : vector<8x32xf32> to vector<8xf32>
    %56 = vector.shape_cast %55 : vector<8xf32> to vector<8x1xf32>
    %cst_40 = arith.constant 3.200000e+01 : f32
    %57 = vector.broadcast %cst_40 : f32 to vector<8x1xf32>
    %58 = arith.divf %56, %57 : vector<8x1xf32>
    %cst_41 = arith.constant 9.99999974E-6 : f32
    %59 = vector.broadcast %cst_41 : f32 to vector<8x1xf32>
    %60 = arith.addf %58, %59 : vector<8x1xf32>
    %61 = math.rsqrt %60 : vector<8x1xf32>
    %62 = vector.broadcast %61 : vector<8x1xf32> to vector<8x32xf32>
    %63 = arith.mulf %53, %62 : vector<8x32xf32>
    %64 = vector.broadcast %46 : vector<1x32xf32> to vector<8x32xf32>
    %65 = arith.mulf %63, %64 : vector<8x32xf32>
    %66 = vector.broadcast %47 : vector<1x32xf32> to vector<8x32xf32>
    %67 = arith.addf %65, %66 : vector<8x32xf32>
    %68 = arith.truncf %67 : vector<8x32xf32> to vector<8x32xbf16>
    %c0_42 = arith.constant 0 : index
    %c0_43 = arith.constant 0 : index
    %c0_44 = arith.constant 0 : index
    %69 = vector.load %arg12[%c0_42, %c0_43, %c0_44] : memref<1x8x32xbf16, #tpu.memory_space<vmem>>, vector<1x8x32xbf16>
    %70 = vector.shape_cast %69 : vector<1x8x32xbf16> to vector<8x32xbf16>
    %71 = vector.shape_cast %68 : vector<8x32xbf16> to vector<1x8x32xbf16>
    tpu.vector_store %arg12[%c0_42, %c0_43, %c0_44], %71 {strides = array<i32>} : memref<1x8x32xbf16, #tpu.memory_space<vmem>>, vector<1x8x32xbf16>,
    return
  }
  func.func @transform_0(%arg0: i32) -> (i32, i32, i32) {
    %c0_i32 = arith.constant 0 : i32
    %c0_i32_0 = arith.constant 0 : i32
    %c0_i32_1 = arith.constant 0 : i32
    return %arg0, %c0_i32, %c0_i32_0 : i32, i32, i32
  }
  func.func @transform_1(%arg0: i32) -> (i32, i32, i32) {
    %c0_i32 = arith.constant 0 : i32
    %c0_i32_0 = arith.constant 0 : i32
    %c0_i32_1 = arith.constant 0 : i32
    %c0_i32_2 = arith.constant 0 : i32
    return %c0_i32, %c0_i32_0, %c0_i32_1 : i32, i32, i32
  }
  func.func @transform_2(%arg0: i32) -> (i32, i32, i32) {
    %c0_i32 = arith.constant 0 : i32
    %c0_i32_0 = arith.constant 0 : i32
    %c0_i32_1 = arith.constant 0 : i32
    %c0_i32_2 = arith.constant 0 : i32
    return %c0_i32, %c0_i32_0, %c0_i32_1 : i32, i32, i32
  }
  func.func @transform_3(%arg0: i32) -> (i32, i32, i32) {
    %c0_i32 = arith.constant 0 : i32
    %c0_i32_0 = arith.constant 0 : i32
    %c0_i32_1 = arith.constant 0 : i32
    %c0_i32_2 = arith.constant 0 : i32
    return %c0_i32, %c0_i32_0, %c0_i32_1 : i32, i32, i32
  }
  func.func @transform_4(%arg0: i32) -> (i32, i32, i32) {
    %c0_i32 = arith.constant 0 : i32
    %c0_i32_0 = arith.constant 0 : i32
    %c0_i32_1 = arith.constant 0 : i32
    %c0_i32_2 = arith.constant 0 : i32
    return %c0_i32, %c0_i32_0, %c0_i32_1 : i32, i32, i32
  }
  func.func @transform_5(%arg0: i32) -> (i32, i32, i32) {
    %c0_i32 = arith.constant 0 : i32
    %c0_i32_0 = arith.constant 0 : i32
    %c0_i32_1 = arith.constant 0 : i32
    %c0_i32_2 = arith.constant 0 : i32
    return %c0_i32, %c0_i32_0, %c0_i32_1 : i32, i32, i32
  }
  func.func @transform_6(%arg0: i32) -> (i32, i32, i32) {
    %c0_i32 = arith.constant 0 : i32
    %c0_i32_0 = arith.constant 0 : i32
    %c0_i32_1 = arith.constant 0 : i32
    %c0_i32_2 = arith.constant 0 : i32
    return %c0_i32, %c0_i32_0, %c0_i32_1 : i32, i32, i32
  }
  func.func @transform_7(%arg0: i32) -> (i32, i32, i32) {
    %c0_i32 = arith.constant 0 : i32
    %c0_i32_0 = arith.constant 0 : i32
    %c0_i32_1 = arith.constant 0 : i32
    %c0_i32_2 = arith.constant 0 : i32
    return %c0_i32, %c0_i32_0, %c0_i32_1 : i32, i32, i32
  }
  func.func @transform_8(%arg0: i32) -> (i32, i32) {
    %c0_i32 = arith.constant 0 : i32
    %c0_i32_0 = arith.constant 0 : i32
    %c0_i32_1 = arith.constant 0 : i32
    return %c0_i32, %c0_i32_0 : i32, i32
  }
  func.func @transform_9(%arg0: i32) -> (i32, i32) {
    %c0_i32 = arith.constant 0 : i32
    %c0_i32_0 = arith.constant 0 : i32
    %c0_i32_1 = arith.constant 0 : i32
    return %c0_i32, %c0_i32_0 : i32, i32
  }
  func.func @transform_10(%arg0: i32) -> (i32, i32) {
    %c0_i32 = arith.constant 0 : i32
    %c0_i32_0 = arith.constant 0 : i32
    %c0_i32_1 = arith.constant 0 : i32
    return %c0_i32, %c0_i32_0 : i32, i32
  }
  func.func @transform_11(%arg0: i32) -> (i32, i32, i32) {
    %c0_i32 = arith.constant 0 : i32
    %c0_i32_0 = arith.constant 0 : i32
    %c0_i32_1 = arith.constant 0 : i32
    return %arg0, %c0_i32, %c0_i32_0 : i32, i32, i32
  }
}

module attributes {stable_mosaic.version = 11 : i64} {
  func.func @_linear_acc_kernel(%arg0: i32, %arg1: i32, %arg2: i32, %arg3: memref<8x32xbf16, #tpu.memory_space<vmem>>, %arg4: memref<32x128xbf16, #tpu.memory_space<vmem>>, %arg5: memref<1x128xf32, #tpu.memory_space<vmem>>, %arg6: memref<8x128xf32, #tpu.memory_space<vmem>>, %arg7: memref<8x128xf32, #tpu.memory_space<vmem>>) attributes {dimension_semantics = [#tpu.dimension_semantics<parallel>, #tpu.dimension_semantics<parallel>, #tpu.dimension_semantics<arbitrary>], iteration_bounds = array<i64: 2, 1, 1>, scalar_prefetch = 0 : i64, scratch_operands = 1 : i64, tpu.core_type = #tpu.core_type<tc>, window_params = [{transform_indices = @transform_0, window_bounds = array<i64: 8, 32>}, {transform_indices = @transform_1, window_bounds = array<i64: 32, 128>}, {transform_indices = @transform_2, window_bounds = array<i64: 1, 128>}, {transform_indices = @transform_3, window_bounds = array<i64: 8, 128>}]} {
    %c0_i32 = arith.constant 0 : i32
    %0 = arith.cmpi eq, %arg2, %c0_i32 : i32
    %1 = arith.extui %0 : i1 to i32
    %c0_i32_0 = arith.constant 0 : i32
    %2 = arith.cmpi ne, %1, %c0_i32_0 : i32
    scf.if %2 {
      %cst_10 = arith.constant 0.000000e+00 : f32
      %12 = vector.broadcast %cst_10 : f32 to vector<8x128xf32>
      %c0_11 = arith.constant 0 : index
      %c0_12 = arith.constant 0 : index
      %13 = vector.load %arg7[%c0_11, %c0_12] : memref<8x128xf32, #tpu.memory_space<vmem>>, vector<8x128xf32>
      tpu.vector_store %arg7[%c0_11, %c0_12], %12 {strides = array<i32>} : memref<8x128xf32, #tpu.memory_space<vmem>>, vector<8x128xf32>,
    } else {
    }
    %c0 = arith.constant 0 : index
    %c0_1 = arith.constant 0 : index
    %3 = vector.load %arg7[%c0, %c0_1] : memref<8x128xf32, #tpu.memory_space<vmem>>, vector<8x128xf32>
    %c0_2 = arith.constant 0 : index
    %c0_3 = arith.constant 0 : index
    %4 = vector.load %arg3[%c0_2, %c0_3] : memref<8x32xbf16, #tpu.memory_space<vmem>>, vector<8x32xbf16>
    %c0_4 = arith.constant 0 : index
    %c0_5 = arith.constant 0 : index
    %5 = vector.load %arg4[%c0_4, %c0_5] : memref<32x128xbf16, #tpu.memory_space<vmem>>, vector<32x128xbf16>
    %cst = arith.constant dense<0.000000e+00> : vector<8x128xf32>
    %6 = tpu.matmul %4, %5, %cst {dimension_numbers = #tpu.dot_dimension_numbers<[1], [0], [0], [1], [0, 0, 1, 1], [], []>} : vector<8x32xbf16>, vector<32x128xbf16>, vector<8x128xf32> -> vector<8x128xf32>
    %7 = arith.addf %3, %6 : vector<8x128xf32>
    %c0_6 = arith.constant 0 : index
    %c0_7 = arith.constant 0 : index
    %8 = vector.load %arg7[%c0_6, %c0_7] : memref<8x128xf32, #tpu.memory_space<vmem>>, vector<8x128xf32>
    tpu.vector_store %arg7[%c0_6, %c0_7], %7 {strides = array<i32>} : memref<8x128xf32, #tpu.memory_space<vmem>>, vector<8x128xf32>,
    %c0_i32_8 = arith.constant 0 : i32
    %9 = arith.cmpi eq, %arg2, %c0_i32_8 : i32
    %10 = arith.extui %9 : i1 to i32
    %c0_i32_9 = arith.constant 0 : i32
    %11 = arith.cmpi ne, %10, %c0_i32_9 : i32
    scf.if %11 {
      %c0_10 = arith.constant 0 : index
      %c0_11 = arith.constant 0 : index
      %12 = vector.load %arg7[%c0_10, %c0_11] : memref<8x128xf32, #tpu.memory_space<vmem>>, vector<8x128xf32>
      %c0_12 = arith.constant 0 : index
      %c0_13 = arith.constant 0 : index
      %13 = vector.load %arg5[%c0_12, %c0_13] : memref<1x128xf32, #tpu.memory_space<vmem>>, vector<1x128xf32>
      %14 = vector.broadcast %13 : vector<1x128xf32> to vector<8x128xf32>
      %15 = arith.addf %12, %14 : vector<8x128xf32>
      %c0_14 = arith.constant 0 : index
      %c0_15 = arith.constant 0 : index
      %16 = vector.load %arg6[%c0_14, %c0_15] : memref<8x128xf32, #tpu.memory_space<vmem>>, vector<8x128xf32>
      tpu.vector_store %arg6[%c0_14, %c0_15], %15 {strides = array<i32>} : memref<8x128xf32, #tpu.memory_space<vmem>>, vector<8x128xf32>,
    } else {
    }
    return
  }
  func.func @transform_0(%arg0: i32, %arg1: i32, %arg2: i32) -> (i32, i32) {
    %c0_i32 = arith.constant 0 : i32
    return %arg0, %arg2 : i32, i32
  }
  func.func @transform_1(%arg0: i32, %arg1: i32, %arg2: i32) -> (i32, i32) {
    %c0_i32 = arith.constant 0 : i32
    return %arg2, %arg1 : i32, i32
  }
  func.func @transform_2(%arg0: i32, %arg1: i32, %arg2: i32) -> (i32, i32) {
    %c0_i32 = arith.constant 0 : i32
    %c0_i32_0 = arith.constant 0 : i32
    return %c0_i32, %arg1 : i32, i32
  }
  func.func @transform_3(%arg0: i32, %arg1: i32, %arg2: i32) -> (i32, i32) {
    %c0_i32 = arith.constant 0 : i32
    return %arg0, %arg1 : i32, i32
  }
}

module attributes {stable_mosaic.version = 11 : i64} {
  func.func @_ffn_add_ln_kernel(%arg0: i32, %arg1: memref<8x32xbf16, #tpu.memory_space<vmem>>, %arg2: memref<32x64xbf16, #tpu.memory_space<vmem>>, %arg3: memref<1x64xf32, #tpu.memory_space<vmem>>, %arg4: memref<64x32xbf16, #tpu.memory_space<vmem>>, %arg5: memref<1x32xf32, #tpu.memory_space<vmem>>, %arg6: memref<1x32xf32, #tpu.memory_space<vmem>>, %arg7: memref<1x32xf32, #tpu.memory_space<vmem>>, %arg8: memref<8x32xbf16, #tpu.memory_space<vmem>>) attributes {dimension_semantics = [#tpu.dimension_semantics<parallel>], iteration_bounds = array<i64: 2>, scalar_prefetch = 0 : i64, scratch_operands = 0 : i64, tpu.core_type = #tpu.core_type<tc>, window_params = [{transform_indices = @transform_0, window_bounds = array<i64: 8, 32>}, {pipeline_mode = #tpu.pipeline_mode<synchronous>, transform_indices = @transform_1, window_bounds = array<i64: 32, 64>}, {pipeline_mode = #tpu.pipeline_mode<synchronous>, transform_indices = @transform_2, window_bounds = array<i64: 1, 64>}, {pipeline_mode = #tpu.pipeline_mode<synchronous>, transform_indices = @transform_3, window_bounds = array<i64: 64, 32>}, {pipeline_mode = #tpu.pipeline_mode<synchronous>, transform_indices = @transform_4, window_bounds = array<i64: 1, 32>}, {pipeline_mode = #tpu.pipeline_mode<synchronous>, transform_indices = @transform_5, window_bounds = array<i64: 1, 32>}, {pipeline_mode = #tpu.pipeline_mode<synchronous>, transform_indices = @transform_6, window_bounds = array<i64: 1, 32>}, {transform_indices = @transform_7, window_bounds = array<i64: 8, 32>}]} {
    %c0 = arith.constant 0 : index
    %c0_0 = arith.constant 0 : index
    %0 = vector.load %arg1[%c0, %c0_0] : memref<8x32xbf16, #tpu.memory_space<vmem>>, vector<8x32xbf16>
    %c0_1 = arith.constant 0 : index
    %c0_2 = arith.constant 0 : index
    %1 = vector.load %arg2[%c0_1, %c0_2] : memref<32x64xbf16, #tpu.memory_space<vmem>>, vector<32x64xbf16>
    %cst = arith.constant dense<0.000000e+00> : vector<8x64xf32>
    %2 = tpu.matmul %0, %1, %cst {dimension_numbers = #tpu.dot_dimension_numbers<[1], [0], [0], [1], [0, 0, 1, 1], [], []>} : vector<8x32xbf16>, vector<32x64xbf16>, vector<8x64xf32> -> vector<8x64xf32>
    %c0_3 = arith.constant 0 : index
    %c0_4 = arith.constant 0 : index
    %3 = vector.load %arg3[%c0_3, %c0_4] : memref<1x64xf32, #tpu.memory_space<vmem>>, vector<1x64xf32>
    %4 = vector.broadcast %3 : vector<1x64xf32> to vector<8x64xf32>
    %5 = arith.addf %2, %4 : vector<8x64xf32>
    %cst_5 = arith.constant 0.000000e+00 : f32
    %6 = vector.broadcast %cst_5 : f32 to vector<8x64xf32>
    %7 = arith.maximumf %5, %6 : vector<8x64xf32>
    %8 = arith.truncf %7 : vector<8x64xf32> to vector<8x64xbf16>
    %c0_6 = arith.constant 0 : index
    %c0_7 = arith.constant 0 : index
    %9 = vector.load %arg4[%c0_6, %c0_7] : memref<64x32xbf16, #tpu.memory_space<vmem>>, vector<64x32xbf16>
    %cst_8 = arith.constant dense<0.000000e+00> : vector<8x32xf32>
    %10 = tpu.matmul %8, %9, %cst_8 {dimension_numbers = #tpu.dot_dimension_numbers<[1], [0], [0], [1], [0, 0, 1, 1], [], []>} : vector<8x64xbf16>, vector<64x32xbf16>, vector<8x32xf32> -> vector<8x32xf32>
    %c0_9 = arith.constant 0 : index
    %c0_10 = arith.constant 0 : index
    %11 = vector.load %arg5[%c0_9, %c0_10] : memref<1x32xf32, #tpu.memory_space<vmem>>, vector<1x32xf32>
    %12 = vector.broadcast %11 : vector<1x32xf32> to vector<8x32xf32>
    %13 = arith.addf %10, %12 : vector<8x32xf32>
    %14 = arith.extf %0 : vector<8x32xbf16> to vector<8x32xf32>
    %15 = arith.addf %14, %13 : vector<8x32xf32>
    %c0_11 = arith.constant 0 : index
    %c0_12 = arith.constant 0 : index
    %16 = vector.load %arg6[%c0_11, %c0_12] : memref<1x32xf32, #tpu.memory_space<vmem>>, vector<1x32xf32>
    %c0_13 = arith.constant 0 : index
    %c0_14 = arith.constant 0 : index
    %17 = vector.load %arg7[%c0_13, %c0_14] : memref<1x32xf32, #tpu.memory_space<vmem>>, vector<1x32xf32>
    %cst_15 = arith.constant dense<0.000000e+00> : vector<8xf32>
    %18 = vector.multi_reduction <add>, %15, %cst_15 [1] : vector<8x32xf32> to vector<8xf32>
    %19 = vector.shape_cast %18 : vector<8xf32> to vector<8x1xf32>
    %cst_16 = arith.constant 3.200000e+01 : f32
    %20 = vector.broadcast %cst_16 : f32 to vector<8x1xf32>
    %21 = arith.divf %19, %20 : vector<8x1xf32>
    %22 = vector.broadcast %21 : vector<8x1xf32> to vector<8x32xf32>
    %23 = arith.subf %15, %22 : vector<8x32xf32>
    %24 = arith.mulf %23, %23 : vector<8x32xf32>
    %cst_17 = arith.constant dense<0.000000e+00> : vector<8xf32>
    %25 = vector.multi_reduction <add>, %24, %cst_17 [1] : vector<8x32xf32> to vector<8xf32>
    %26 = vector.shape_cast %25 : vector<8xf32> to vector<8x1xf32>
    %cst_18 = arith.constant 3.200000e+01 : f32
    %27 = vector.broadcast %cst_18 : f32 to vector<8x1xf32>
    %28 = arith.divf %26, %27 : vector<8x1xf32>
    %cst_19 = arith.constant 9.99999974E-6 : f32
    %29 = vector.broadcast %cst_19 : f32 to vector<8x1xf32>
    %30 = arith.addf %28, %29 : vector<8x1xf32>
    %31 = math.rsqrt %30 : vector<8x1xf32>
    %32 = vector.broadcast %31 : vector<8x1xf32> to vector<8x32xf32>
    %33 = arith.mulf %23, %32 : vector<8x32xf32>
    %34 = vector.broadcast %16 : vector<1x32xf32> to vector<8x32xf32>
    %35 = arith.mulf %33, %34 : vector<8x32xf32>
    %36 = vector.broadcast %17 : vector<1x32xf32> to vector<8x32xf32>
    %37 = arith.addf %35, %36 : vector<8x32xf32>
    %38 = arith.truncf %37 : vector<8x32xf32> to vector<8x32xbf16>
    %c0_20 = arith.constant 0 : index
    %c0_21 = arith.constant 0 : index
    %39 = vector.load %arg8[%c0_20, %c0_21] : memref<8x32xbf16, #tpu.memory_space<vmem>>, vector<8x32xbf16>
    tpu.vector_store %arg8[%c0_20, %c0_21], %38 {strides = array<i32>} : memref<8x32xbf16, #tpu.memory_space<vmem>>, vector<8x32xbf16>,
    return
  }
  func.func @transform_0(%arg0: i32) -> (i32, i32) {
    %c0_i32 = arith.constant 0 : i32
    %c0_i32_0 = arith.constant 0 : i32
    return %arg0, %c0_i32 : i32, i32
  }
  func.func @transform_1(%arg0: i32) -> (i32, i32) {
    %c0_i32 = arith.constant 0 : i32
    %c0_i32_0 = arith.constant 0 : i32
    %c0_i32_1 = arith.constant 0 : i32
    return %c0_i32, %c0_i32_0 : i32, i32
  }
  func.func @transform_2(%arg0: i32) -> (i32, i32) {
    %c0_i32 = arith.constant 0 : i32
    %c0_i32_0 = arith.constant 0 : i32
    %c0_i32_1 = arith.constant 0 : i32
    return %c0_i32, %c0_i32_0 : i32, i32
  }
  func.func @transform_3(%arg0: i32) -> (i32, i32) {
    %c0_i32 = arith.constant 0 : i32
    %c0_i32_0 = arith.constant 0 : i32
    %c0_i32_1 = arith.constant 0 : i32
    return %c0_i32, %c0_i32_0 : i32, i32
  }
  func.func @transform_4(%arg0: i32) -> (i32, i32) {
    %c0_i32 = arith.constant 0 : i32
    %c0_i32_0 = arith.constant 0 : i32
    %c0_i32_1 = arith.constant 0 : i32
    return %c0_i32, %c0_i32_0 : i32, i32
  }
  func.func @transform_5(%arg0: i32) -> (i32, i32) {
    %c0_i32 = arith.constant 0 : i32
    %c0_i32_0 = arith.constant 0 : i32
    %c0_i32_1 = arith.constant 0 : i32
    return %c0_i32, %c0_i32_0 : i32, i32
  }
  func.func @transform_6(%arg0: i32) -> (i32, i32) {
    %c0_i32 = arith.constant 0 : i32
    %c0_i32_0 = arith.constant 0 : i32
    %c0_i32_1 = arith.constant 0 : i32
    return %c0_i32, %c0_i32_0 : i32, i32
  }
  func.func @transform_7(%arg0: i32) -> (i32, i32) {
    %c0_i32 = arith.constant 0 : i32
    %c0_i32_0 = arith.constant 0 : i32
    return %arg0, %c0_i32 : i32, i32
  }
}

module attributes {stable_mosaic.version = 11 : i64} {
  func.func @_cross_attn_ln_kernel(%arg0: i32, %arg1: memref<1x8x32xbf16, #tpu.memory_space<vmem>>, %arg2: memref<1x8x32xbf16, #tpu.memory_space<vmem>>, %arg3: memref<4x32x8xbf16, #tpu.memory_space<vmem>>, %arg4: memref<4x1x8xf32, #tpu.memory_space<vmem>>, %arg5: memref<4x32x8xbf16, #tpu.memory_space<vmem>>, %arg6: memref<4x1x8xf32, #tpu.memory_space<vmem>>, %arg7: memref<4x32x8xbf16, #tpu.memory_space<vmem>>, %arg8: memref<4x1x8xf32, #tpu.memory_space<vmem>>, %arg9: memref<4x8x32xbf16, #tpu.memory_space<vmem>>, %arg10: memref<1x32xf32, #tpu.memory_space<vmem>>, %arg11: memref<1x32xf32, #tpu.memory_space<vmem>>, %arg12: memref<1x32xf32, #tpu.memory_space<vmem>>, %arg13: memref<1x8x32xbf16, #tpu.memory_space<vmem>>) attributes {dimension_semantics = [#tpu.dimension_semantics<parallel>], iteration_bounds = array<i64: 2>, scalar_prefetch = 0 : i64, scratch_operands = 0 : i64, tpu.core_type = #tpu.core_type<tc>, window_params = [{transform_indices = @transform_0, window_bounds = array<i64: 1, 8, 32>}, {transform_indices = @transform_1, window_bounds = array<i64: 1, 8, 32>}, {pipeline_mode = #tpu.pipeline_mode<synchronous>, transform_indices = @transform_2, window_bounds = array<i64: 4, 32, 8>}, {pipeline_mode = #tpu.pipeline_mode<synchronous>, transform_indices = @transform_3, window_bounds = array<i64: 4, 1, 8>}, {pipeline_mode = #tpu.pipeline_mode<synchronous>, transform_indices = @transform_4, window_bounds = array<i64: 4, 32, 8>}, {pipeline_mode = #tpu.pipeline_mode<synchronous>, transform_indices = @transform_5, window_bounds = array<i64: 4, 1, 8>}, {pipeline_mode = #tpu.pipeline_mode<synchronous>, transform_indices = @transform_6, window_bounds = array<i64: 4, 32, 8>}, {pipeline_mode = #tpu.pipeline_mode<synchronous>, transform_indices = @transform_7, window_bounds = array<i64: 4, 1, 8>}, {pipeline_mode = #tpu.pipeline_mode<synchronous>, transform_indices = @transform_8, window_bounds = array<i64: 4, 8, 32>}, {pipeline_mode = #tpu.pipeline_mode<synchronous>, transform_indices = @transform_9, window_bounds = array<i64: 1, 32>}, {pipeline_mode = #tpu.pipeline_mode<synchronous>, transform_indices = @transform_10, window_bounds = array<i64: 1, 32>}, {pipeline_mode = #tpu.pipeline_mode<synchronous>, transform_indices = @transform_11, window_bounds = array<i64: 1, 32>}, {transform_indices = @transform_12, window_bounds = array<i64: 1, 8, 32>}]} {
    %c0 = arith.constant 0 : index
    %c0_0 = arith.constant 0 : index
    %c0_1 = arith.constant 0 : index
    %0 = vector.load %arg1[%c0, %c0_0, %c0_1] : memref<1x8x32xbf16, #tpu.memory_space<vmem>>, vector<1x8x32xbf16>
    %1 = vector.shape_cast %0 : vector<1x8x32xbf16> to vector<8x32xbf16>
    %c0_2 = arith.constant 0 : index
    %c0_3 = arith.constant 0 : index
    %c0_4 = arith.constant 0 : index
    %2 = vector.load %arg2[%c0_2, %c0_3, %c0_4] : memref<1x8x32xbf16, #tpu.memory_space<vmem>>, vector<1x8x32xbf16>
    %3 = vector.shape_cast %2 : vector<1x8x32xbf16> to vector<8x32xbf16>
    %c0_5 = arith.constant 0 : index
    %c0_6 = arith.constant 0 : index
    %c0_7 = arith.constant 0 : index
    %4 = vector.load %arg3[%c0_5, %c0_6, %c0_7] : memref<4x32x8xbf16, #tpu.memory_space<vmem>>, vector<4x32x8xbf16>
    %c0_8 = arith.constant 0 : index
    %c0_9 = arith.constant 0 : index
    %c0_10 = arith.constant 0 : index
    %5 = vector.load %arg4[%c0_8, %c0_9, %c0_10] : memref<4x1x8xf32, #tpu.memory_space<vmem>>, vector<4x1x8xf32>
    %c0_11 = arith.constant 0 : index
    %c0_12 = arith.constant 0 : index
    %c0_13 = arith.constant 0 : index
    %6 = vector.load %arg5[%c0_11, %c0_12, %c0_13] : memref<4x32x8xbf16, #tpu.memory_space<vmem>>, vector<4x32x8xbf16>
    %c0_14 = arith.constant 0 : index
    %c0_15 = arith.constant 0 : index
    %c0_16 = arith.constant 0 : index
    %7 = vector.load %arg6[%c0_14, %c0_15, %c0_16] : memref<4x1x8xf32, #tpu.memory_space<vmem>>, vector<4x1x8xf32>
    %c0_17 = arith.constant 0 : index
    %c0_18 = arith.constant 0 : index
    %c0_19 = arith.constant 0 : index
    %8 = vector.load %arg7[%c0_17, %c0_18, %c0_19] : memref<4x32x8xbf16, #tpu.memory_space<vmem>>, vector<4x32x8xbf16>
    %c0_20 = arith.constant 0 : index
    %c0_21 = arith.constant 0 : index
    %c0_22 = arith.constant 0 : index
    %9 = vector.load %arg8[%c0_20, %c0_21, %c0_22] : memref<4x1x8xf32, #tpu.memory_space<vmem>>, vector<4x1x8xf32>
    %c0_23 = arith.constant 0 : index
    %c0_24 = arith.constant 0 : index
    %c0_25 = arith.constant 0 : index
    %10 = vector.load %arg9[%c0_23, %c0_24, %c0_25] : memref<4x8x32xbf16, #tpu.memory_space<vmem>>, vector<4x8x32xbf16>
    %c0_26 = arith.constant 0 : index
    %c0_27 = arith.constant 0 : index
    %11 = vector.load %arg10[%c0_26, %c0_27] : memref<1x32xf32, #tpu.memory_space<vmem>>, vector<1x32xf32>
    %12 = vector.shape_cast %1 : vector<8x32xbf16> to vector<1x8x32xbf16>
    %13 = vector.broadcast %12 : vector<1x8x32xbf16> to vector<4x8x32xbf16>
    %14 = vector.shape_cast %3 : vector<8x32xbf16> to vector<1x8x32xbf16>
    %15 = vector.broadcast %14 : vector<1x8x32xbf16> to vector<4x8x32xbf16>
    "tpu.trace_start"() <{level = 10 : i32, message = "hsd,hdf->hsf"}> : () -> ()
    %cst = arith.constant dense<0.000000e+00> : vector<4x8x8xf32>
    %16 = tpu.matmul %13, %4, %cst {dimension_numbers = #tpu.dot_dimension_numbers<[2], [1], [1], [2], [0, 0, 0, 1, 1, 2], [0], [0]>} : vector<4x8x32xbf16>, vector<4x32x8xbf16>, vector<4x8x8xf32> -> vector<4x8x8xf32>
    "tpu.trace_stop"() : () -> ()
    %17 = vector.broadcast %5 : vector<4x1x8xf32> to vector<4x8x8xf32>
    %18 = arith.addf %16, %17 : vector<4x8x8xf32>
    "tpu.trace_start"() <{level = 10 : i32, message = "hsd,hdf->hsf"}> : () -> ()
    %cst_28 = arith.constant dense<0.000000e+00> : vector<4x8x8xf32>
    %19 = tpu.matmul %15, %6, %cst_28 {dimension_numbers = #tpu.dot_dimension_numbers<[2], [1], [1], [2], [0, 0, 0, 1, 1, 2], [0], [0]>} : vector<4x8x32xbf16>, vector<4x32x8xbf16>, vector<4x8x8xf32> -> vector<4x8x8xf32>
    "tpu.trace_stop"() : () -> ()
    %20 = vector.broadcast %7 : vector<4x1x8xf32> to vector<4x8x8xf32>
    %21 = arith.addf %19, %20 : vector<4x8x8xf32>
    "tpu.trace_start"() <{level = 10 : i32, message = "hsd,hdf->hsf"}> : () -> ()
    %cst_29 = arith.constant dense<0.000000e+00> : vector<4x8x8xf32>
    %22 = tpu.matmul %15, %8, %cst_29 {dimension_numbers = #tpu.dot_dimension_numbers<[2], [1], [1], [2], [0, 0, 0, 1, 1, 2], [0], [0]>} : vector<4x8x32xbf16>, vector<4x32x8xbf16>, vector<4x8x8xf32> -> vector<4x8x8xf32>
    "tpu.trace_stop"() : () -> ()
    %23 = vector.broadcast %9 : vector<4x1x8xf32> to vector<4x8x8xf32>
    %24 = arith.addf %22, %23 : vector<4x8x8xf32>
    %25 = arith.truncf %18 : vector<4x8x8xf32> to vector<4x8x8xbf16>
    %26 = arith.truncf %21 : vector<4x8x8xf32> to vector<4x8x8xbf16>
    "tpu.trace_start"() <{level = 10 : i32, message = "hqd,hkd->hqk"}> : () -> ()
    %cst_30 = arith.constant dense<0.000000e+00> : vector<4x8x8xf32>
    %27 = tpu.matmul %25, %26, %cst_30 {dimension_numbers = #tpu.dot_dimension_numbers<[2], [2], [1], [1], [0, 0, 0, 1, 1, 1], [0], [0]>} : vector<4x8x8xbf16>, vector<4x8x8xbf16>, vector<4x8x8xf32> -> vector<4x8x8xf32>
    "tpu.trace_stop"() : () -> ()
    %cst_31 = arith.constant dense<0xFF800000> : vector<4x8xf32>
    %28 = vector.multi_reduction <maximumf>, %27, %cst_31 [2] : vector<4x8x8xf32> to vector<4x8xf32>
    %29 = vector.shape_cast %28 : vector<4x8xf32> to vector<4x8x1xf32>
    %30 = vector.broadcast %29 : vector<4x8x1xf32> to vector<4x8x8xf32>
    %31 = arith.subf %27, %30 : vector<4x8x8xf32>
    %32 = math.exp %31 : vector<4x8x8xf32>
    %cst_32 = arith.constant dense<0.000000e+00> : vector<4x8xf32>
    %33 = vector.multi_reduction <add>, %32, %cst_32 [2] : vector<4x8x8xf32> to vector<4x8xf32>
    %34 = vector.shape_cast %33 : vector<4x8xf32> to vector<4x8x1xf32>
    %35 = tpu.reciprocal %34 {approx = true} : vector<4x8x1xf32> -> vector<4x8x1xf32>
    %36 = vector.broadcast %35 : vector<4x8x1xf32> to vector<4x8x8xf32>
    %37 = arith.mulf %32, %36 : vector<4x8x8xf32>
    %38 = arith.truncf %37 : vector<4x8x8xf32> to vector<4x8x8xbf16>
    %39 = arith.truncf %24 : vector<4x8x8xf32> to vector<4x8x8xbf16>
    "tpu.trace_start"() <{level = 10 : i32, message = "hqk,hkd->hqd"}> : () -> ()
    %cst_33 = arith.constant dense<0.000000e+00> : vector<4x8x8xf32>
    %40 = tpu.matmul %38, %39, %cst_33 {dimension_numbers = #tpu.dot_dimension_numbers<[2], [1], [1], [2], [0, 0, 0, 1, 1, 2], [0], [0]>} : vector<4x8x8xbf16>, vector<4x8x8xbf16>, vector<4x8x8xf32> -> vector<4x8x8xf32>
    "tpu.trace_stop"() : () -> ()
    %41 = arith.truncf %40 : vector<4x8x8xf32> to vector<4x8x8xbf16>
    "tpu.trace_start"() <{level = 10 : i32, message = "hqd,hdf->hqf"}> : () -> ()
    %cst_34 = arith.constant dense<0.000000e+00> : vector<4x8x32xf32>
    %42 = tpu.matmul %41, %10, %cst_34 {dimension_numbers = #tpu.dot_dimension_numbers<[2], [1], [1], [2], [0, 0, 0, 1, 1, 2], [0], [0]>} : vector<4x8x8xbf16>, vector<4x8x32xbf16>, vector<4x8x32xf32> -> vector<4x8x32xf32>
    "tpu.trace_stop"() : () -> ()
    %cst_35 = arith.constant dense<0.000000e+00> : vector<8x32xf32>
    %43 = vector.multi_reduction <add>, %42, %cst_35 [0] : vector<4x8x32xf32> to vector<8x32xf32>
    %44 = vector.broadcast %11 : vector<1x32xf32> to vector<8x32xf32>
    %45 = arith.addf %43, %44 : vector<8x32xf32>
    %46 = arith.extf %1 : vector<8x32xbf16> to vector<8x32xf32>
    %47 = arith.addf %46, %45 : vector<8x32xf32>
    %c0_36 = arith.constant 0 : index
    %c0_37 = arith.constant 0 : index
    %48 = vector.load %arg11[%c0_36, %c0_37] : memref<1x32xf32, #tpu.memory_space<vmem>>, vector<1x32xf32>
    %c0_38 = arith.constant 0 : index
    %c0_39 = arith.constant 0 : index
    %49 = vector.load %arg12[%c0_38, %c0_39] : memref<1x32xf32, #tpu.memory_space<vmem>>, vector<1x32xf32>
    %cst_40 = arith.constant dense<0.000000e+00> : vector<8xf32>
    %50 = vector.multi_reduction <add>, %47, %cst_40 [1] : vector<8x32xf32> to vector<8xf32>
    %51 = vector.shape_cast %50 : vector<8xf32> to vector<8x1xf32>
    %cst_41 = arith.constant 3.200000e+01 : f32
    %52 = vector.broadcast %cst_41 : f32 to vector<8x1xf32>
    %53 = arith.divf %51, %52 : vector<8x1xf32>
    %54 = vector.broadcast %53 : vector<8x1xf32> to vector<8x32xf32>
    %55 = arith.subf %47, %54 : vector<8x32xf32>
    %56 = arith.mulf %55, %55 : vector<8x32xf32>
    %cst_42 = arith.constant dense<0.000000e+00> : vector<8xf32>
    %57 = vector.multi_reduction <add>, %56, %cst_42 [1] : vector<8x32xf32> to vector<8xf32>
    %58 = vector.shape_cast %57 : vector<8xf32> to vector<8x1xf32>
    %cst_43 = arith.constant 3.200000e+01 : f32
    %59 = vector.broadcast %cst_43 : f32 to vector<8x1xf32>
    %60 = arith.divf %58, %59 : vector<8x1xf32>
    %cst_44 = arith.constant 9.99999974E-6 : f32
    %61 = vector.broadcast %cst_44 : f32 to vector<8x1xf32>
    %62 = arith.addf %60, %61 : vector<8x1xf32>
    %63 = math.rsqrt %62 : vector<8x1xf32>
    %64 = vector.broadcast %63 : vector<8x1xf32> to vector<8x32xf32>
    %65 = arith.mulf %55, %64 : vector<8x32xf32>
    %66 = vector.broadcast %48 : vector<1x32xf32> to vector<8x32xf32>
    %67 = arith.mulf %65, %66 : vector<8x32xf32>
    %68 = vector.broadcast %49 : vector<1x32xf32> to vector<8x32xf32>
    %69 = arith.addf %67, %68 : vector<8x32xf32>
    %70 = arith.truncf %69 : vector<8x32xf32> to vector<8x32xbf16>
    %c0_45 = arith.constant 0 : index
    %c0_46 = arith.constant 0 : index
    %c0_47 = arith.constant 0 : index
    %71 = vector.load %arg13[%c0_45, %c0_46, %c0_47] : memref<1x8x32xbf16, #tpu.memory_space<vmem>>, vector<1x8x32xbf16>
    %72 = vector.shape_cast %71 : vector<1x8x32xbf16> to vector<8x32xbf16>
    %73 = vector.shape_cast %70 : vector<8x32xbf16> to vector<1x8x32xbf16>
    tpu.vector_store %arg13[%c0_45, %c0_46, %c0_47], %73 {strides = array<i32>} : memref<1x8x32xbf16, #tpu.memory_space<vmem>>, vector<1x8x32xbf16>,
    return
  }
  func.func @transform_0(%arg0: i32) -> (i32, i32, i32) {
    %c0_i32 = arith.constant 0 : i32
    %c0_i32_0 = arith.constant 0 : i32
    %c0_i32_1 = arith.constant 0 : i32
    return %arg0, %c0_i32, %c0_i32_0 : i32, i32, i32
  }
  func.func @transform_1(%arg0: i32) -> (i32, i32, i32) {
    %c0_i32 = arith.constant 0 : i32
    %c0_i32_0 = arith.constant 0 : i32
    %c0_i32_1 = arith.constant 0 : i32
    return %arg0, %c0_i32, %c0_i32_0 : i32, i32, i32
  }
  func.func @transform_2(%arg0: i32) -> (i32, i32, i32) {
    %c0_i32 = arith.constant 0 : i32
    %c0_i32_0 = arith.constant 0 : i32
    %c0_i32_1 = arith.constant 0 : i32
    %c0_i32_2 = arith.constant 0 : i32
    return %c0_i32, %c0_i32_0, %c0_i32_1 : i32, i32, i32
  }
  func.func @transform_3(%arg0: i32) -> (i32, i32, i32) {
    %c0_i32 = arith.constant 0 : i32
    %c0_i32_0 = arith.constant 0 : i32
    %c0_i32_1 = arith.constant 0 : i32
    %c0_i32_2 = arith.constant 0 : i32
    return %c0_i32, %c0_i32_0, %c0_i32_1 : i32, i32, i32
  }
  func.func @transform_4(%arg0: i32) -> (i32, i32, i32) {
    %c0_i32 = arith.constant 0 : i32
    %c0_i32_0 = arith.constant 0 : i32
    %c0_i32_1 = arith.constant 0 : i32
    %c0_i32_2 = arith.constant 0 : i32
    return %c0_i32, %c0_i32_0, %c0_i32_1 : i32, i32, i32
  }
  func.func @transform_5(%arg0: i32) -> (i32, i32, i32) {
    %c0_i32 = arith.constant 0 : i32
    %c0_i32_0 = arith.constant 0 : i32
    %c0_i32_1 = arith.constant 0 : i32
    %c0_i32_2 = arith.constant 0 : i32
    return %c0_i32, %c0_i32_0, %c0_i32_1 : i32, i32, i32
  }
  func.func @transform_6(%arg0: i32) -> (i32, i32, i32) {
    %c0_i32 = arith.constant 0 : i32
    %c0_i32_0 = arith.constant 0 : i32
    %c0_i32_1 = arith.constant 0 : i32
    %c0_i32_2 = arith.constant 0 : i32
    return %c0_i32, %c0_i32_0, %c0_i32_1 : i32, i32, i32
  }
  func.func @transform_7(%arg0: i32) -> (i32, i32, i32) {
    %c0_i32 = arith.constant 0 : i32
    %c0_i32_0 = arith.constant 0 : i32
    %c0_i32_1 = arith.constant 0 : i32
    %c0_i32_2 = arith.constant 0 : i32
    return %c0_i32, %c0_i32_0, %c0_i32_1 : i32, i32, i32
  }
  func.func @transform_8(%arg0: i32) -> (i32, i32, i32) {
    %c0_i32 = arith.constant 0 : i32
    %c0_i32_0 = arith.constant 0 : i32
    %c0_i32_1 = arith.constant 0 : i32
    %c0_i32_2 = arith.constant 0 : i32
    return %c0_i32, %c0_i32_0, %c0_i32_1 : i32, i32, i32
  }
  func.func @transform_9(%arg0: i32) -> (i32, i32) {
    %c0_i32 = arith.constant 0 : i32
    %c0_i32_0 = arith.constant 0 : i32
    %c0_i32_1 = arith.constant 0 : i32
    return %c0_i32, %c0_i32_0 : i32, i32
  }
  func.func @transform_10(%arg0: i32) -> (i32, i32) {
    %c0_i32 = arith.constant 0 : i32
    %c0_i32_0 = arith.constant 0 : i32
    %c0_i32_1 = arith.constant 0 : i32
    return %c0_i32, %c0_i32_0 : i32, i32
  }
  func.func @transform_11(%arg0: i32) -> (i32, i32) {
    %c0_i32 = arith.constant 0 : i32
    %c0_i32_0 = arith.constant 0 : i32
    %c0_i32_1 = arith.constant 0 : i32
    return %c0_i32, %c0_i32_0 : i32, i32
  }
  func.func @transform_12(%arg0: i32) -> (i32, i32, i32) {
    %c0_i32 = arith.constant 0 : i32
    %c0_i32_0 = arith.constant 0 : i32
    %c0_i32_1 = arith.constant 0 : i32
    return %arg0, %c0_i32, %c0_i32_0 : i32, i32, i32
  }
}

</mosaic_0001>

<bundles_post_ra>
// kernel: transformer_forward.9
= control target key start
LH: loop header
LB: loop body
LE: loop exit
PB: predicated region body
PF: predicated region fallthrough
CT: control target
= control target key end

     0   :  { %s633_s24 = smov 0   ;;  %s690_s0 = inlined_call_operand.vmem [shape: bf16[16,32], index: 0, kind: input, shape index: {}]   ;;  %s691_s1 = inlined_call_operand.vmem [shape: bf16[32,64], index: 1, kind: input, shape index: {}]   ;;  %s692_s2 = inlined_call_operand.vmem [shape: f32[1,64], index: 2, kind: input, shape index: {}]   ;;  %s693_s3 = inlined_call_operand.vmem [shape: bf16[64,32], index: 3, kind: input, shape index: {}]   ;;  %s694_s4 = inlined_call_operand.vmem [shape: f32[1,32], index: 4, kind: input, shape index: {}]   ;;  %s695_s5 = inlined_call_operand.vmem [shape: f32[1,32], index: 5, kind: input, shape index: {}]   ;;  %s696_s6 = inlined_call_operand.vmem [shape: f32[1,32], index: 6, kind: input, shape index: {}]   ;;  %s697_s7 = inlined_call_operand.vmem [shape: bf16[16,32], index: 7, kind: output, shape index: {}]  }
   0x1 LB: > { %s516_s25 = sadd.s32 4294967295, %s589_s24   ;;  %p520_p0 = scmp.ge.s32.totalorder %s589_s24, 1  ;;  %s589_s24 = sphi %s633_s24, %s17_s24  }
   0x2   : > { %p236_p1 = scmp.lt.s32.totalorder %s589_s24, 3 }
   0x4   : > { %p237_p2 = pnand %p520_p0, %p236_p1 }
   0x5   : > { %v575_v0 = vld [vmem:[%s691_s1] sm:$0xff] (!%p237_p2)   ;;  %v591_v1 = vmov (!%p237_p2), 0.0   ;;  %v576_v2 = vld [vmem:[%s691_s1 + $0x8] sm:$0xff] (!%p237_p2)   ;;  %vm592_vm0 = vmmov (!%p237_p2), 0   ;;  %p266_p3 = scmp.lt.s32.totalorder (!%p237_p2), %s516_s25, 1  ;;  %vm299_vm1 = vcmask (!%p237_p2), 261120  }
   0x6   : > { %240 = sbr.rel (%p237_p2) target bundleno = 767 (0x2ff), region = 48  ;;  %545 = vmatprep.subr.bf16.mxu0 (!%p237_p2), %v591_v1  ;;  %553 = vmatprep.subr.bf16.mxu1 (!%p237_p2), %v591_v1  ;;  %v577_v3 = vld [vmem:[%s693_s3] sm:$0xff] (!%p237_p2)   ;;  %v578_v4 = vld [vmem:[%s693_s3 + $0x8] sm:$0xff] (!%p237_p2)   ;;  %v579_v6 = vld [vmem:[%s693_s3 + $0x10] sm:$0xff] (!%p237_p2)   ;;  %vm384_vm2 = vcmask (!%p237_p2), 523264   ;;  %vm461_vm3 = vcmask (!%p237_p2), 257024  }
   0x7   : > { %546 = vmatpush3.bf16.msra.mxu0 (!%p237_p2), %v575_v0  ;;  %549 = vmatprep.mubr.msk.bf16.mxu0 (!%p237_p2), %vm592_vm0, %v591_v1  ;;  %v580_v7 = vld [vmem:[%s693_s3 + $0x18] sm:$0xff] (!%p237_p2)   ;;  %v523_v8 = vld [vmem:[%s692_s2] ss:$0 sm:$0xff] (!%p237_p2) }
   0x8   : > { %547 = vmatprep.subr.bf16.mxu0 (!%p237_p2), %v591_v1  ;;  %561 = vmatprep.mubr.msk.bf16.mxu1 (!%p237_p2), %vm592_vm0, %v591_v1  ;;  %v527_v16 = vld [vmem:[%s694_s4] ss:$0 sm:$0xff] (!%p237_p2) }
   0x9   : > { %554 = vmatpush3.bf16.msra.mxu1 (!%p237_p2), %v577_v3  ;;  %v533_v34 = vld [vmem:[%s695_s5] ss:$0 sm:$0xff] (!%p237_p2) }
   0xa   : > { %555 = vmatprep.subr.bf16.mxu1 (!%p237_p2), %v591_v1  ;;  %v534_v36 = vld [vmem:[%s696_s6] ss:$0 sm:$0xff] (!%p237_p2) }
   0xb   : > { %548 = vmatpush3.bf16.msra.mxu0 (!%p237_p2), %v576_v2 }
   0xd   : > { %s699_s25 = smov (!%p266_p3, %s516_s25), 1  ;;  %556 = vmatpush3.bf16.msra.mxu1 %v578_v4 }
   0xe   : > { %s521_s11 = sshll.u32 %s699_s25, 2  ;;  %557 = vmatprep.subr.bf16.mxu1 %v591_v1 }
   0xf   : > { %s269_s14 = scalar_lea.vmem %s690_s0, %s521_s11  ;;  %s273_s8 = scalar_lea.vmem %s697_s7, %s521_s11 }
  0x10   : > { %v275_v5 = vld [vmem:[%s269_s14] sm:$0xf] }
  0x11   : > { %550 = vmatmul.mubr.msk.bf16.vlgmr.msra.gmra.mrb[0].mxu0 %vm299_vm1, %v275_v5  ;;  %558 = vmatpush3.bf16.msra.mxu1 %v579_v6  ;;  %v428_v17 = vunpack.c.l.bf16 %v275_v5 }
  0x12   : > { %559 = vmatprep.subr.bf16.mxu1 %v591_v1 }
  0x15   : > { %560 = vmatpush3.bf16.msra.mxu1 %v580_v7 }
  0xe4   : > { %v337_v9 = vpop.f32.mrb[0].mxu0 }
  0xe5   : > { %v338_v10 = vadd.f32 %v523_v8, %v337_v9  ;;  %v551_v11 = vpop.f32.mrb[1].mxu0 }
  0xe6   : > { %v340_v12 = vpop.f32.mrb[2].mxu0 }
  0xe7   : > { %v343_v13 = vmax.f32 %v338_v10, 0.0  ;;  %v552_v14 = vpop.f32.mrb[3].mxu0 }
  0xe9   : > { %v344_v15 = vpack.c.bf16 %v343_v13, %v343_v13 }
  0xeb   : > { %562 = vmatmul.mubr.msk.bf16.vlgmr.msra.gmra.mrb[0].mxu1 %vm384_vm2, %v344_v15 }
 0x1be   : > { %v422_v18 = vpop.f32.mrb[0].mxu1 }
 0x1bf   : > { %v423_v19 = vadd.f32 %v527_v16, %v422_v18  ;;  %v563_v20 = vpop.f32.mrb[1].mxu1 }
 0x1c0   : > { %v425_v21 = vpop.f32.mrb[2].mxu1 }
 0x1c1   : > { %v564_v22 = vpop.f32.mrb[3].mxu1  ;;  %v429_v23 = vadd.f32 %v428_v17, %v423_v19 }
 0x1c3   : > { %v432_v24 = vsel %vm299_vm1, %v429_v23, 0.0 }
 0x1c4   : > { %433 = vadd.xlane.f32.xlu0 %v432_v24 }
 0x251   : > { %v434_v25 = vpop.xlane.xlu0 %433 }
 0x252   : > { %v436_v26 = vmul.f32 0.03125, %v434_v25 }
 0x254   : > { %v437_v27 = vsub.f32 %v429_v23, %v436_v26 }
 0x256   : > { %v438_v28 = vmul.f32 %v437_v27, %v437_v27 }
 0x258   : > { %v439_v29 = vsel %vm299_vm1, %v438_v28, 0.0 }
 0x259   : > { %440 = vadd.xlane.f32.xlu0 %v439_v29 }
 0x2e6   : > { %v441_v30 = vpop.xlane.xlu0 %440 }
 0x2e7   : > { %v442_v31 = vmul.f32 0.03125, %v441_v30 }
 0x2e9   : > { %v443_v32 = vadd.f32 1e-05, %v442_v31 }
 0x2eb   : > { %581 = vrsqrt.f32 %v443_v32 }
 0x2f5   : > { %v582_v33 = vpop.eup %581 }
 0x2f6   : > { %v445_v35 = vmul.f32 %v582_v33, %v437_v27 }
 0x2f8   : > { %v452_v37 = vmul.f32 %v533_v34, %v445_v35 }
 0x2fa   : > { %v459_v38 = vadd.f32 %v534_v36, %v452_v37 }
 0x2fc   : > { %v460_v39 = vpack.c.bf16 %v459_v38, %v459_v38 }
 0x2fe   : > { %462 = vst.msk [vmem:[%s273_s8] sm:$0xf] %vm461_vm3, %v460_v39 }
 0x2ff PF: > { %s17_s24 = sadd.s32 1, %s589_s24  }
 0x300   : > { %p14_p4 = scmp.ge.s32.totalorder %s17_s24, 4  }
 0x302   :  { %16 = sbr.rel (!%p14_p4) target bundleno = 1 (0x1), region = 78 }

// kernel: transformer_forward.15
= control target key start
LH: loop header
LB: loop body
LE: loop exit
PB: predicated region body
PF: predicated region fallthrough
CT: control target
= control target key end

     0   :  { %s542_s12 = smov 0   ;;  %s544_s13 = smov 0   ;;  %s584_s0 = inlined_call_operand.vmem [shape: bf16[16,32], index: 0, kind: input, shape index: {}]   ;;  %s585_s1 = inlined_call_operand.vmem [shape: bf16[32,128], index: 1, kind: input, shape index: {}]   ;;  %s586_s2 = inlined_call_operand.vmem [shape: f32[1,128], index: 2, kind: input, shape index: {}]   ;;  %s587_s3 = inlined_call_operand.vmem [shape: f32[16,128], index: 3, kind: output, shape index: {}]  }
   0x1   :  { %s546_s14 = smov 0  }
   0x2 LB: > { %s32_s15 = sadd.s32 1, %s514_s13  ;;  %p448_p0 = scmp.ge.s32.totalorder %s518_s14, 1  ;;  %s518_s14 = sphi %s546_s14, %s13_s14   ;;  %s514_s13 = sphi %s544_s13, %s589_s13   ;;  %s510_s12 = sphi %s542_s12, %s588_s12  }
   0x3   : > { %p34_p1 = scmp.ge.s32.totalorder %s32_s15, 2  ;;  %p186_p2 = scmp.lt.s32.totalorder %s518_s14, 3 }
   0x5   : > { %s591_s15 = smov (%p34_p1, %s32_s15), 0  ;;  %p187_p3 = pnand %p448_p0, %p186_p2 }
   0x6   : > { %v494_v0 = vld [vmem:[%s585_s1] sm:$0xff] (!%p187_p3)   ;;  %v520_v1 = vmov (!%p187_p3), 0.0   ;;  %v495_v2 = vld [vmem:[%s585_s1 + $0x8] sm:$0xff] (!%p187_p3)   ;;  %vm521_vm0 = vmmov (!%p187_p3), 0   ;;  %p225_p4 = scmp.lt.s32.totalorder (!%p187_p3), %s510_s12, 1  ;;  %vm275_vm1 = vcmask (!%p187_p3), 261120  }
   0x7   : > { %190 = sbr.rel (%p187_p3) target bundleno = 233 (0xe9), region = 32  ;;  %460 = vmatprep.subr.bf16.mxu0 (!%p187_p3), %v520_v1  ;;  %464 = vmatprep.mubr.msk.bf16.mxu0 (!%p187_p3), %vm521_vm0, %v520_v1  ;;  %v454_v4 = vld [vmem:[%s586_s2] ss:$0 sm:$0xff] (!%p187_p3) }
   0x8   : > { %461 = vmatpush3.bf16.msra.mxu0 (!%p187_p3), %v494_v0 }
   0x9   : > { %462 = vmatprep.subr.bf16.mxu0 (!%p187_p3), %v520_v1 }
   0xc   : > { %463 = vmatpush3.bf16.msra.mxu0 (!%p187_p3), %v495_v2 }
   0xe   : > { %s593_s12 = smov (!%p225_p4, %s510_s12), 1 }
   0xf   : > { %s449_s20 = sshll.u32 %s593_s12, 2  ;;  %s450_s24 = sshll.u32 %s593_s12, 3 }
  0x10   : > { %s231_s23 = scalar_lea.vmem %s584_s0, %s449_s20  ;;  %s250_s29 = scalar_lea.vmem %s587_s3, %s450_s24 }
  0x11   : > { %v258_v3 = vld [vmem:[%s231_s23] sm:$0xf] }
  0x12   : > { %465 = vmatmul.mubr.msk.bf16.vlgmr.msra.gmra.mrb[0].mxu0 %vm275_vm1, %v258_v3 }
  0xe5   : > { %v313_v5 = vpop.f32.mrb[0].mxu0 }
  0xe6   : > { %v332_v6 = vadd.f32 %v454_v4, %v313_v5  ;;  %v466_v7 = vpop.f32.mrb[1].mxu0 }
  0xe7   : > { %v316_v8 = vpop.f32.mrb[2].mxu0 }
  0xe8   : > { %333 = vst [vmem:[%s250_s29] sm:$0xff] %v332_v6  ;;  %v467_v9 = vpop.f32.mrb[3].mxu0 }
  0xe9 PF: > { %s13_s14 = sadd.s32 1, %s518_s14   ;;  %s588_s12 = smov %s514_s13 }
  0xea   : > { %p10_p5 = scmp.ge.s32.totalorder %s13_s14, 4   ;;  %s589_s13 = smov %s591_s15 }
  0xec   :  { %12 = sbr.rel (!%p10_p5) target bundleno = 2 (0x2), region = 76 }

// kernel: transformer_forward.13
= control target key start
LH: loop header
LB: loop body
LE: loop exit
PB: predicated region body
PF: predicated region fallthrough
CT: control target
= control target key end

     0   :  { %s2357_s21 = smov 0   ;;  %s2658_s0 = inlined_call_operand.vmem [shape: bf16[2,8,32], index: 0, kind: input, shape index: {}]   ;;  %s2659_s1 = inlined_call_operand.vmem [shape: bf16[2,8,32], index: 1, kind: input, shape index: {}]   ;;  %s2660_s2 = inlined_call_operand.vmem [shape: bf16[4,32,8], index: 2, kind: input, shape index: {}]   ;;  %s2661_s3 = inlined_call_operand.vmem [shape: f32[4,1,8], index: 3, kind: input, shape index: {}]   ;;  %s2662_s4 = inlined_call_operand.vmem [shape: bf16[4,32,8], index: 4, kind: input, shape index: {}]   ;;  %s2663_s5 = inlined_call_operand.vmem [shape: f32[4,1,8], index: 5, kind: input, shape index: {}]   ;;  %s2664_s6 = inlined_call_operand.vmem [shape: bf16[4,32,8], index: 6, kind: input, shape index: {}]   ;;  %s2665_s7 = inlined_call_operand.vmem [shape: f32[4,1,8], index: 7, kind: input, shape index: {}]   ;;  %s2666_s8 = inlined_call_operand.vmem [shape: bf16[4,8,32], index: 8, kind: input, shape index: {}]   ;;  %s2667_s9 = inlined_call_operand.vmem [shape: f32[1,32], index: 9, kind: input, shape index: {}]   ;;  %s2668_s10 = inlined_call_operand.vmem [shape: f32[1,32], index: 10, kind: input, shape index: {}]   ;;  %s2669_s11 = inlined_call_operand.vmem [shape: f32[1,32], index: 11, kind: input, shape index: {}]   ;;  %s2670_s12 = inlined_call_operand.vmem [shape: bf16[2,8,32], index: 12, kind: output, shape index: {}]  }
   0x1 LB: > { %s1929_s22 = sadd.s32 4294967295, %s2288_s21   ;;  %p1933_p0 = scmp.ge.s32.totalorder %s2288_s21, 1  ;;  %s2288_s21 = sphi %s2357_s21, %s22_s21  }
   0x2   : > { %p370_p1 = scmp.lt.s32.totalorder %s2288_s21, 3 }
   0x4   : > { %p371_p2 = pnand %p1933_p0, %p370_p1 }
   0x5   : > { %v2240_v0 = vld [vmem:[%s2660_s2] sm:$0xff] (!%p371_p2)   ;;  %v2290_v1 = vmov (!%p371_p2), 0.0   ;;  %v2241_v2 = vld [vmem:[%s2660_s2 + $0x10] sm:$0xff] (!%p371_p2)   ;;  %v2242_v3 = vld [vmem:[%s2660_s2 + $0x8] sm:$0xff] (!%p371_p2)   ;;  %vm2291_vm0 = vmmov (!%p371_p2), 0   ;;  %p414_p3 = scmp.lt.s32.totalorder (!%p371_p2), %s1929_s22, 1 }
   0x6   : > { %374 = sbr.rel (%p371_p2) target bundleno = 1546 (0x60a), region = 68  ;;  %2062 = vmatprep.subr.bf16.mxu0 (!%p371_p2), %v2290_v1  ;;  %2070 = vmatprep.subr.bf16.mxu1 (!%p371_p2), %v2290_v1  ;;  %v2243_v4 = vld [vmem:[%s2660_s2 + $0x18] sm:$0xff] (!%p371_p2)   ;;  %vm530_vm1 = vcmask (!%p371_p2), 261120   ;;  %v2244_v5 = vld [vmem:[%s2660_s2 + $0x20] sm:$0xff] (!%p371_p2)   ;;  %v2245_v6 = vld [vmem:[%s2660_s2 + $0x30] sm:$0xff] (!%p371_p2)   ;;  %vm1205_vm2 = vcmask (!%p371_p2), 64512  }
   0x7   : > { %2063 = vmatpush3.bf16.msra.mxu0 (!%p371_p2), %v2240_v0  ;;  %2066 = vmatprep.mubr.msk.bf16.mxu0 (!%p371_p2), %vm2291_vm0, %v2290_v1  ;;  %v2246_v8 = vld [vmem:[%s2660_s2 + $0x28] sm:$0xff] (!%p371_p2)   ;;  %v2247_v9 = vld [vmem:[%s2660_s2 + $0x38] sm:$0xff] (!%p371_p2)   ;;  %v2248_v10 = vld [vmem:[%s2662_s4] sm:$0xff] (!%p371_p2)   ;;  %vm1445_vm3 = vcmask (!%p371_p2), 1043456   ;;  %vm1862_vm4 = vcmask (!%p371_p2), 257024  }
   0x8   : > { %2071 = vmatpush3.bf16.msra.mxu1 (!%p371_p2), %v2241_v2  ;;  %2064 = vmatprep.subr.bf16.mxu0 (!%p371_p2), %v2290_v1  ;;  %v2249_v11 = vld [vmem:[%s2662_s4 + $0x10] sm:$0xff] (!%p371_p2)   ;;  %v2250_v12 = vld [vmem:[%s2662_s4 + $0x8] sm:$0xff] (!%p371_p2)   ;;  %v2251_v13 = vld [vmem:[%s2662_s4 + $0x18] sm:$0xff] (!%p371_p2)  }
   0x9   : > { %2072 = vmatprep.subr.bf16.mxu1 (!%p371_p2), %v2290_v1  ;;  %2074 = vmatprep.mubr.msk.bf16.mxu1 (!%p371_p2), %vm2291_vm0, %v2290_v1  ;;  %v2252_v15 = vld [vmem:[%s2662_s4 + $0x20] sm:$0xff] (!%p371_p2)   ;;  %v2253_v16 = vld [vmem:[%s2662_s4 + $0x30] sm:$0xff] (!%p371_p2)   ;;  %v2254_v17 = vld [vmem:[%s2662_s4 + $0x28] sm:$0xff] (!%p371_p2)  }
   0xa   : > { %v2255_v18 = vld [vmem:[%s2662_s4 + $0x38] sm:$0xff] (!%p371_p2)   ;;  %v2256_v19 = vld [vmem:[%s2664_s6] sm:$0xff] (!%p371_p2)   ;;  %v2257_v20 = vld [vmem:[%s2664_s6 + $0x10] sm:$0xff] (!%p371_p2)  }
   0xb   : > { %2065 = vmatpush3.bf16.msra.mxu0 (!%p371_p2), %v2242_v3  ;;  %v2258_v21 = vld [vmem:[%s2664_s6 + $0x8] sm:$0xff] (!%p371_p2)   ;;  %v2259_v22 = vld [vmem:[%s2664_s6 + $0x18] sm:$0xff] (!%p371_p2)   ;;  %v2260_v23 = vld [vmem:[%s2664_s6 + $0x20] sm:$0xff] (!%p371_p2)  }
   0xc   : > { %2073 = vmatpush3.bf16.msra.mxu1 (!%p371_p2), %v2243_v4  ;;  %2078 = vmatprep.subr.bf16.mxu0 (!%p371_p2), %v2290_v1  ;;  %v2261_v24 = vld [vmem:[%s2664_s6 + $0x30] sm:$0xff] (!%p371_p2)   ;;  %v2262_v25 = vld [vmem:[%s2664_s6 + $0x28] sm:$0xff] (!%p371_p2)   ;;  %v2263_v26 = vld [vmem:[%s2664_s6 + $0x38] sm:$0xff] (!%p371_p2)  }
   0xd   : > { %s2672_s22 = smov (!%p414_p3, %s1929_s22), 1  ;;  %2086 = vmatprep.subr.bf16.mxu1 %v2290_v1  ;;  %v1953_v43 = vld [vmem:[%s2663_s5] ss:$0 sm:$0xff]  ;;  %v1954_v44 = vld [vmem:[%s2663_s5 + $0x1] ss:$0 sm:$0xff] }
   0xe   : > { %s2385_s13 = sshll.u32 %s2672_s22, 2  ;;  %v1937_v55 = vld [vmem:[%s2661_s3] ss:$0 sm:$0xff]  ;;  %v1938_v58 = vld [vmem:[%s2661_s3 + $0x1] ss:$0 sm:$0xff] }
   0xf   : > { %s417_s18 = scalar_lea.vmem %s2658_s0, %s2385_s13  ;;  %s421_s15 = scalar_lea.vmem %s2659_s1, %s2385_s13  ;;  %v1955_v61 = vld [vmem:[%s2663_s5 + $0x2] ss:$0 sm:$0xff]  ;;  %v1956_v63 = vld [vmem:[%s2663_s5 + $0x3] ss:$0 sm:$0xff] }
  0x10   : > { %v2398_v7 = vld [vmem:[%s417_s18] sm:$0xf]  ;;  %s425_s20 = scalar_lea.vmem %s2670_s12, %s2385_s13 }
  0x11   : > { %2067 = vmatmul.mubr.msk.bf16.vlgmr.msra.gmra.mrb[0].mxu0 %vm530_vm1, %v2398_v7  ;;  %2075 = vmatmul.mubr.msk.bf16.vlgmr.msra.gmra.mrb[0].mxu1 %vm530_vm1, %v2398_v7  ;;  %v428_v14 = vld [vmem:[%s421_s15] sm:$0xf] }
  0x12   : > { %2079 = vmatpush3.bf16.msra.mxu0 %v2244_v5  ;;  %2087 = vmatpush3.bf16.msra.mxu1 %v2245_v6 }
  0x13   : > { %2080 = vmatprep.subr.bf16.mxu0 %v2290_v1  ;;  %2088 = vmatprep.subr.bf16.mxu1 %v2290_v1 }
  0x14   : > { %2082 = vmatprep.mubr.msk.bf16.mxu0 %vm2291_vm0, %v2290_v1  ;;  %2090 = vmatprep.mubr.msk.bf16.mxu1 %vm2291_vm0, %v2290_v1 }
  0x16   : > { %2081 = vmatpush3.bf16.msra.mxu0 %v2246_v8  ;;  %2089 = vmatpush3.bf16.msra.mxu1 %v2247_v9 }
  0x17   : > { %2094 = vmatprep.subr.bf16.mxu0 %v2290_v1  ;;  %2102 = vmatprep.subr.bf16.mxu1 %v2290_v1 }
  0x19   : > { %2083 = vmatmul.mubr.msk.bf16.vlgmr.msra.gmra.mrb[4].mxu0 %vm530_vm1, %v2398_v7  ;;  %2091 = vmatmul.mubr.msk.bf16.vlgmr.msra.gmra.mrb[4].mxu1 %vm530_vm1, %v2398_v7 }
  0x1a   : > { %2095 = vmatpush3.bf16.msra.mxu0 %v2248_v10  ;;  %2103 = vmatpush3.bf16.msra.mxu1 %v2249_v11 }
  0x1b   : > { %2096 = vmatprep.subr.bf16.mxu0 %v2290_v1  ;;  %2104 = vmatprep.subr.bf16.mxu1 %v2290_v1 }
  0x1c   : > { %2098 = vmatprep.mubr.msk.bf16.mxu0 %vm2291_vm0, %v2290_v1  ;;  %2106 = vmatprep.mubr.msk.bf16.mxu1 %vm2291_vm0, %v2290_v1 }
  0x1e   : > { %2097 = vmatpush3.bf16.msra.mxu0 %v2250_v12  ;;  %2105 = vmatpush3.bf16.msra.mxu1 %v2251_v13 }
  0x1f   : > { %2110 = vmatprep.subr.bf16.mxu0 %v2290_v1  ;;  %2118 = vmatprep.subr.bf16.mxu1 %v2290_v1 }
  0x21   : > { %2099 = vmatmul.mubr.msk.bf16.vlgmr.msra.gmra.mrb[8].mxu0 %vm530_vm1, %v428_v14  ;;  %2107 = vmatmul.mubr.msk.bf16.vlgmr.msra.gmra.mrb[8].mxu1 %vm530_vm1, %v428_v14 }
  0x22   : > { %2111 = vmatpush3.bf16.msra.mxu0 %v2252_v15  ;;  %2119 = vmatpush3.bf16.msra.mxu1 %v2253_v16  ;;  %v1939_v15 = vld [vmem:[%s2661_s3 + $0x2] ss:$0 sm:$0xff] }
  0x23   : > { %2112 = vmatprep.subr.bf16.mxu0 %v2290_v1  ;;  %2120 = vmatprep.subr.bf16.mxu1 %v2290_v1 }
  0x24   : > { %2114 = vmatprep.mubr.msk.bf16.mxu0 %vm2291_vm0, %v2290_v1  ;;  %2122 = vmatprep.mubr.msk.bf16.mxu1 %vm2291_vm0, %v2290_v1 }
  0x26   : > { %2113 = vmatpush3.bf16.msra.mxu0 %v2254_v17  ;;  %2121 = vmatpush3.bf16.msra.mxu1 %v2255_v18  ;;  %v1940_v18 = vld [vmem:[%s2661_s3 + $0x3] ss:$0 sm:$0xff] }
  0x27   : > { %2126 = vmatprep.subr.bf16.mxu0 %v2290_v1  ;;  %2134 = vmatprep.subr.bf16.mxu1 %v2290_v1 }
  0x29   : > { %2115 = vmatmul.mubr.msk.bf16.vlgmr.msra.gmra.mrb[12].mxu0 %vm530_vm1, %v428_v14  ;;  %2123 = vmatmul.mubr.msk.bf16.vlgmr.msra.gmra.mrb[12].mxu1 %vm530_vm1, %v428_v14 }
  0x2a   : > { %2127 = vmatpush3.bf16.msra.mxu0 %v2256_v19  ;;  %2130 = vmatprep.mubr.msk.bf16.mxu0 %vm2291_vm0, %v2290_v1 }
  0x2b   : > { %2128 = vmatprep.subr.bf16.mxu0 %v2290_v1  ;;  %2138 = vmatprep.mubr.msk.bf16.mxu1 %vm2291_vm0, %v2290_v1 }
  0x2c   : > { %2135 = vmatpush3.bf16.msra.mxu1 %v2257_v20 }
  0x2d   : > { %2136 = vmatprep.subr.bf16.mxu1 %v2290_v1 }
  0x2e   : > { %2129 = vmatpush3.bf16.msra.mxu0 %v2258_v21 }
  0x2f   : > { %2142 = vmatprep.subr.bf16.mxu0 %v2290_v1 }
  0x30   : > { %2137 = vmatpush3.bf16.msra.mxu1 %v2259_v22 }
  0x31   : > { %2131 = vmatmul.mubr.msk.bf16.vlgmr.msra.gmra.mrb[16].mxu0 %vm530_vm1, %v428_v14  ;;  %2150 = vmatprep.subr.bf16.mxu1 %v2290_v1 }
  0x32   : > { %2146 = vmatprep.mubr.msk.bf16.mxu0 %vm2291_vm0, %v2290_v1  ;;  %2143 = vmatpush3.bf16.msra.mxu0 %v2260_v23 }
  0x33   : > { %2139 = vmatmul.mubr.msk.bf16.vlgmr.msra.gmra.mrb[16].mxu1 %vm530_vm1, %v428_v14  ;;  %2144 = vmatprep.subr.bf16.mxu0 %v2290_v1 }
  0x34   : > { %2151 = vmatpush3.bf16.msra.mxu1 %v2261_v24  ;;  %2154 = vmatprep.mubr.msk.bf16.mxu1 %vm2291_vm0, %v2290_v1 }
  0x35   : > { %2152 = vmatprep.subr.bf16.mxu1 %v2290_v1 }
  0x36   : > { %2145 = vmatpush3.bf16.msra.mxu0 %v2262_v25  ;;  %v1969_v25 = vld [vmem:[%s2665_s7] ss:$0 sm:$0xff] }
  0x37   : > { %2158 = vmatprep.subr.bf16.mxu0 %v2290_v1 }
  0x38   : > { %2153 = vmatpush3.bf16.msra.mxu1 %v2263_v26 }
  0x39   : > { %2164 = vmatprep.subr.bf16.mxu1 %v2290_v1  ;;  %2147 = vmatmul.mubr.msk.bf16.vlgmr.msra.gmra.mrb[20].mxu0 %vm530_vm1, %v428_v14 }
  0x3a   : > { %2160 = vmatprep.mubr.msk.bf16.mxu0 %vm2291_vm0, %v2290_v1 }
  0x3b   : > { %2155 = vmatmul.mubr.msk.bf16.vlgmr.msra.gmra.mrb[20].mxu1 %vm530_vm1, %v428_v14 }
  0x3c   : > { %2166 = vmatprep.mubr.msk.bf16.mxu1 %vm2291_vm0, %v2290_v1 }
  0xe4   : > { %v568_v27 = vpop.f32.mrb[0].mxu0  ;;  %v620_v29 = vpop.f32.mrb[0].mxu1 }
  0xe5   : > { %v2068_v28 = vpop.f32.mrb[1].mxu0  ;;  %v2076_v31 = vpop.f32.mrb[1].mxu1  ;;  %v569_v62 = vadd.f32 %v1937_v55, %v568_v27  ;;  %v621_v0 = vadd.f32 %v1938_v58, %v620_v29  ;;  %v1970_v27 = vld [vmem:[%s2665_s7 + $0x1] ss:$0 sm:$0xff] }
  0xe6   : > { %v571_v30 = vpop.f32.mrb[2].mxu0  ;;  %v623_v33 = vpop.f32.mrb[2].mxu1 }
  0xe7   : > { %v2069_v32 = vpop.f32.mrb[3].mxu0  ;;  %v2077_v34 = vpop.f32.mrb[3].mxu1  ;;  %v1197_v10 = vpack.c.bf16 %v569_v62, %v569_v62  ;;  %v1198_v14 = vpack.c.bf16 %v621_v0, %v621_v0 }
  0xec   : > { %v672_v35 = vpop.f32.mrb[4].mxu0  ;;  %v724_v37 = vpop.f32.mrb[4].mxu1 }
  0xed   : > { %v2084_v36 = vpop.f32.mrb[5].mxu0  ;;  %v2092_v39 = vpop.f32.mrb[5].mxu1  ;;  %v673_v21 = vadd.f32 %v1939_v15, %v672_v35  ;;  %v725_v22 = vadd.f32 %v1940_v18, %v724_v37 }
  0xee   : > { %v675_v38 = vpop.f32.mrb[6].mxu0  ;;  %v727_v41 = vpop.f32.mrb[6].mxu1 }
  0xef   : > { %v2085_v40 = vpop.f32.mrb[7].mxu0  ;;  %v2093_v42 = vpop.f32.mrb[7].mxu1  ;;  %v1199_v23 = vpack.c.bf16 %v673_v21, %v673_v21  ;;  %v1200_v24 = vpack.c.bf16 %v725_v22, %v725_v22 }
  0xf4   : > { %v803_v45 = vpop.f32.mrb[8].mxu0  ;;  %v855_v47 = vpop.f32.mrb[8].mxu1 }
  0xf5   : > { %v804_v46 = vadd.f32 %v1953_v43, %v803_v45  ;;  %v2100_v48 = vpop.f32.mrb[9].mxu0  ;;  %v856_v49 = vadd.f32 %v1954_v44, %v855_v47  ;;  %v2108_v51 = vpop.f32.mrb[9].mxu1 }
  0xf6   : > { %v806_v50 = vpop.f32.mrb[10].mxu0  ;;  %v858_v54 = vpop.f32.mrb[10].mxu1 }
  0xf7   : > { %v1201_v52 = vpack.c.bf16 %v804_v46, %v804_v46  ;;  %v2101_v53 = vpop.f32.mrb[11].mxu0  ;;  %v1202_v56 = vpack.c.bf16 %v856_v49, %v856_v49  ;;  %v2109_v57 = vpop.f32.mrb[11].mxu1 }
  0xf9   : > { %v1210_v59 = vsel %vm1205_vm2, %v1201_v52, 0  ;;  %v1256_v60 = vsel %vm1205_vm2, %v1202_v56, 0 }
  0xfa   : > { %2159 = vmatpush3.bf16.xpose.msra.mxu0 %v1210_v59  ;;  %2165 = vmatpush3.bf16.xpose.msra.mxu1 %v1256_v60 }
  0xfb   : > { %2170 = vmatprep.subr.bf16.mxu0 %v2290_v1  ;;  %2176 = vmatprep.subr.bf16.mxu1 %v2290_v1 }
  0xfc   : > { %v907_v2 = vpop.f32.mrb[12].mxu0  ;;  %v959_v4 = vpop.f32.mrb[12].mxu1 }
  0xfd   : > { %v908_v3 = vadd.f32 %v1955_v61, %v907_v2  ;;  %v2116_v5 = vpop.f32.mrb[13].mxu0  ;;  %v960_v6 = vadd.f32 %v1956_v63, %v959_v4  ;;  %v2124_v9 = vpop.f32.mrb[13].mxu1 }
  0xfe   : > { %v910_v8 = vpop.f32.mrb[14].mxu0  ;;  %v962_v13 = vpop.f32.mrb[14].mxu1 }
  0xff   : > { %v1203_v11 = vpack.c.bf16 %v908_v3, %v908_v3  ;;  %v2117_v12 = vpop.f32.mrb[15].mxu0  ;;  %v1204_v16 = vpack.c.bf16 %v960_v6, %v960_v6  ;;  %v2125_v17 = vpop.f32.mrb[15].mxu1 }
 0x101   : > { %v1302_v19 = vsel %vm1205_vm2, %v1203_v11, 0  ;;  %2161 = vmatmul.mubr.msk.bf16.vlgmr.msra.gmra.mrb[24].mxu0 %vm1205_vm2, %v1197_v10  ;;  %v1348_v20 = vsel %vm1205_vm2, %v1204_v16, 0  ;;  %2167 = vmatmul.mubr.msk.bf16.vlgmr.msra.gmra.mrb[24].mxu1 %vm1205_vm2, %v1198_v14 }
 0x102   : > { %2171 = vmatpush3.bf16.xpose.msra.mxu0 %v1302_v19  ;;  %2177 = vmatpush3.bf16.xpose.msra.mxu1 %v1348_v20 }
 0x103   : > { %2172 = vmatprep.mubr.msk.bf16.mxu0 %vm2291_vm0, %v2290_v1  ;;  %2178 = vmatprep.mubr.msk.bf16.mxu1 %vm2291_vm0, %v2290_v1 }
 0x104   : > { %2182 = vmatprep.subr.bf16.mxu0 %v2290_v1  ;;  %2188 = vmatprep.subr.bf16.mxu1 %v2290_v1  ;;  %v1035_v26 = vpop.f32.mrb[16].mxu0 }
 0x105   : > { %v1036_v28 = vadd.f32 %v1969_v25, %v1035_v26  ;;  %v2132_v29 = vpop.f32.mrb[17].mxu0 }
 0x106   : > { %v1038_v30 = vpop.f32.mrb[18].mxu0  ;;  %v1087_v31 = vpop.f32.mrb[16].mxu1  ;;  %v1971_v29 = vld [vmem:[%s2665_s7 + $0x2] ss:$0 sm:$0xff] }
 0x107   : > { %v1438_v32 = vpack.c.bf16 %v1036_v28, %v1036_v28  ;;  %v2133_v33 = vpop.f32.mrb[19].mxu0  ;;  %v1088_v34 = vadd.f32 %v1970_v27, %v1087_v31  ;;  %v2140_v35 = vpop.f32.mrb[17].mxu1 }
 0x108   : > { %v1090_v36 = vpop.f32.mrb[18].mxu1 }
 0x109   : > { %2173 = vmatmul.mubr.msk.bf16.vlgmr.msra.gmra.mrb[28].mxu0 %vm1205_vm2, %v1199_v23  ;;  %2179 = vmatmul.mubr.msk.bf16.vlgmr.msra.gmra.mrb[28].mxu1 %vm1205_vm2, %v1200_v24  ;;  %v1447_v37 = vsel %vm1445_vm3, %v1438_v32, 0  ;;  %v1439_v38 = vpack.c.bf16 %v1088_v34, %v1088_v34  ;;  %v2141_v39 = vpop.f32.mrb[19].mxu1  ;;  %v1972_v32 = vld [vmem:[%s2665_s7 + $0x3] ss:$0 sm:$0xff] }
 0x10a   : > { %2184 = vmatprep.mubr.msk.bf16.mxu0 %vm2291_vm0, %v2290_v1  ;;  %2190 = vmatprep.mubr.msk.bf16.mxu1 %vm2291_vm0, %v2290_v1 }
 0x10b   : > { %2183 = vmatpush3.bf16.msra.mxu0 %v1447_v37  ;;  %v1493_v40 = vsel %vm1445_vm3, %v1439_v38, 0 }
 0x10c   : > { %2194 = vmatprep.subr.bf16.mxu0 %v2290_v1  ;;  %2189 = vmatpush3.bf16.msra.mxu1 %v1493_v40  ;;  %v2573_v41 = vpop.f32.mrb[20].mxu0 }
 0x10d   : > { %2200 = vmatprep.subr.bf16.mxu1 %v2290_v1  ;;  %v2148_v43 = vpop.f32.mrb[21].mxu0  ;;  %v1140_v30 = vadd.f32 %v1971_v29, %v2573_v41 }
 0x10e   : > { %v2575_v42 = vpop.f32.mrb[20].mxu1  ;;  %v1142_v45 = vpop.f32.mrb[22].mxu0 }
 0x10f   : > { %v2156_v44 = vpop.f32.mrb[21].mxu1  ;;  %v2149_v47 = vpop.f32.mrb[23].mxu0  ;;  %v1440_v34 = vpack.c.bf16 %v1140_v30, %v1140_v30  ;;  %v1192_v35 = vadd.f32 %v1972_v32, %v2575_v42  ;;  %v489_v42 = vld [vmem:[%s2666_s8] sm:$0xf] }
 0x110   : > { %v1194_v46 = vpop.f32.mrb[22].mxu1 }
 0x111   : > { %v2157_v48 = vpop.f32.mrb[23].mxu1  ;;  %v1539_v40 = vsel %vm1445_vm3, %v1440_v34, 0  ;;  %v1441_v43 = vpack.c.bf16 %v1192_v35, %v1192_v35  ;;  %v1997_v34 = vld [vmem:[%s2667_s9] ss:$0 sm:$0xff] }
 0x113   : > { %v1585_v46 = vsel %vm1445_vm3, %v1441_v43, 0 }
 0x1d4   : > { %v1246_v49 = vpop.f32.mrb[24].mxu0  ;;  %v1292_v50 = vpop.f32.mrb[24].mxu1 }
 0x1d5   : > { %v2162_v51 = vpop.f32.mrb[25].mxu0  ;;  %v1390_v52 = vsel %vm1205_vm2, %v1246_v49, -inf  ;;  %v2168_v53 = vpop.f32.mrb[25].mxu1  ;;  %v1393_v58 = vsel %vm1205_vm2, %v1292_v50, -inf }
 0x1d6   : > { %1391 = vmax.xlane.f32.xlu0 %v1390_v52  ;;  %v1249_v54 = vpop.f32.mrb[26].mxu0  ;;  %v1295_v55 = vpop.f32.mrb[26].mxu1  ;;  %v490_v53 = vld [vmem:[%s2666_s8 + $0x4] sm:$0xf] }
 0x1d7   : > { %v2163_v56 = vpop.f32.mrb[27].mxu0  ;;  %v2169_v57 = vpop.f32.mrb[27].mxu1  ;;  %v1681_v54 = vsel %vm1445_vm3, %v490_v53, 0  ;;  %v491_v55 = vld [vmem:[%s2666_s8 + $0x8] sm:$0xf] }
 0x1da   : > { %1394 = vmax.xlane.f32.xlu0 %v1393_v58 }
 0x1dc   : > { %v1338_v59 = vpop.f32.mrb[28].mxu0  ;;  %v1384_v60 = vpop.f32.mrb[28].mxu1 }
 0x1dd   : > { %v2174_v61 = vpop.f32.mrb[29].mxu0  ;;  %v1396_v62 = vsel %vm1205_vm2, %v1338_v59, -inf  ;;  %v2180_v63 = vpop.f32.mrb[29].mxu1  ;;  %v1399_v5 = vsel %vm1205_vm2, %v1384_v60, -inf }
 0x1de   : > { %1397 = vmax.xlane.f32.xlu1 %v1396_v62  ;;  %v1341_v0 = vpop.f32.mrb[30].mxu0  ;;  %v1387_v2 = vpop.f32.mrb[30].mxu1  ;;  %v492_v61 = vld [vmem:[%s2666_s8 + $0xc] sm:$0xf] }
 0x1df   : > { %v2175_v3 = vpop.f32.mrb[31].mxu0  ;;  %v2181_v4 = vpop.f32.mrb[31].mxu1 }
 0x1e0   : > { %v1773_v3 = vsel %vm1445_vm3, %v492_v61, 0 }
 0x1e2   : > { %1400 = vmax.xlane.f32.xlu1 %v1399_v5 }
 0x263   : > { %v1392_v6 = vpop.xlane.xlu0 %1391 }
 0x264   : > { %v1402_v8 = vsub.f32 %v1246_v49, %v1392_v6  ;;  %v1635_v49 = vsel %vm1445_vm3, %v489_v42, 0 }
 0x266   : > { %v1406_v9 = vmul.f32 1.442695, %v1402_v8 }
 0x267   : > { %v1395_v10 = vpop.xlane.xlu0 %1394 }
 0x268   : > { %2264 = vpow2.f32 %v1406_v9  ;;  %v1403_v11 = vsub.f32 %v1292_v50, %v1395_v10 }
 0x26a   : > { %v1408_v12 = vmul.f32 1.442695, %v1403_v11 }
 0x26b   : > { %v1398_v13 = vpop.xlane.xlu1 %1397 }
 0x26c   : > { %2266 = vpow2.f32 %v1408_v12  ;;  %v1404_v14 = vsub.f32 %v1338_v59, %v1398_v13  ;;  %v1727_v59 = vsel %vm1445_vm3, %v491_v55, 0 }
 0x26e   : > { %v1410_v15 = vmul.f32 1.442695, %v1404_v14 }
 0x26f   : > { %v1401_v16 = vpop.xlane.xlu1 %1400 }
 0x270   : > { %2268 = vpow2.f32 %v1410_v15  ;;  %v1405_v17 = vsub.f32 %v1384_v60, %v1401_v16 }
 0x272   : > { %v2265_v18 = vpop.eup %2264  ;;  %v1412_v19 = vmul.f32 1.442695, %v1405_v17 }
 0x273   : > { %v1414_v20 = vsel %vm1205_vm2, %v2265_v18, 0.0 }
 0x274   : > { %2270 = vpow2.f32 %v1412_v19  ;;  %1415 = vadd.xlane.f32.xlu0 %v1414_v20 }
 0x276   : > { %v2267_v21 = vpop.eup %2266 }
 0x277   : > { %v1417_v22 = vsel %vm1205_vm2, %v2267_v21, 0.0 }
 0x278   : > { %1418 = vadd.xlane.f32.xlu1 %v1417_v22 }
 0x27a   : > { %v2269_v23 = vpop.eup %2268 }
 0x27b   : > { %v1420_v24 = vsel %vm1205_vm2, %v2269_v23, 0.0 }
 0x27c   : > { %1421 = vadd.xlane.f32.xlu0 %v1420_v24 }
 0x27e   : > { %v2271_v25 = vpop.eup %2270 }
 0x27f   : > { %v1423_v26 = vsel %vm1205_vm2, %v2271_v25, 0.0 }
 0x280   : > { %1424 = vadd.xlane.f32.xlu1 %v1423_v26 }
 0x301   : > { %v1416_v27 = vpop.xlane.xlu0 %1415 }
 0x302   : > { %2272 = vrcp.f32 %v1416_v27 }
 0x305   : > { %v1419_v28 = vpop.xlane.xlu1 %1418 }
 0x306   : > { %2274 = vrcp.f32 %v1419_v28 }
 0x309   : > { %v1422_v31 = vpop.xlane.xlu0 %1421 }
 0x30a   : > { %2276 = vrcp.f32 %v1422_v31 }
 0x30c   : > { %v2273_v33 = vpop.eup %2272 }
 0x30d   : > { %v1430_v36 = vmul.f32 %v2273_v33, %v2265_v18  ;;  %v1425_v37 = vpop.xlane.xlu1 %1424 }
 0x30e   : > { %2278 = vrcp.f32 %v1425_v37 }
 0x30f   : > { %v1434_v38 = vpack.c.bf16 %v1430_v36, %v1430_v36 }
 0x310   : > { %v2275_v39 = vpop.eup %2274 }
 0x311   : > { %v1431_v44 = vmul.f32 %v2275_v39, %v2267_v21  ;;  %2185 = vmatmul.mubr.msk.bf16.vlgmr.msra.gmra.mrb[32].mxu0 %vm1205_vm2, %v1434_v38  ;;  %v1829_v39 = vunpack.c.l.bf16 %v2398_v7  ;;  %v1998_v7 = vld [vmem:[%s2668_s10] ss:$0 sm:$0xff] }
 0x312   : > { %2195 = vmatpush3.bf16.msra.mxu0 %v1539_v40  ;;  %2196 = vmatprep.mubr.msk.bf16.mxu0 %vm2291_vm0, %v2290_v1 }
 0x313   : > { %v1435_v41 = vpack.c.bf16 %v1431_v44, %v1431_v44  ;;  %2206 = vmatprep.subr.bf16.mxu0 %v2290_v1 }
 0x314   : > { %v2277_v45 = vpop.eup %2276 }
 0x315   : > { %v1432_v47 = vmul.f32 %v2277_v45, %v2269_v23  ;;  %2191 = vmatmul.mubr.msk.bf16.vlgmr.msra.gmra.mrb[32].mxu1 %vm1205_vm2, %v1435_v41 }
 0x316   : > { %2201 = vmatpush3.bf16.msra.mxu1 %v1585_v46  ;;  %2202 = vmatprep.mubr.msk.bf16.mxu1 %vm2291_vm0, %v2290_v1 }
 0x317   : > { %v1436_v48 = vpack.c.bf16 %v1432_v47, %v1432_v47  ;;  %2212 = vmatprep.subr.bf16.mxu1 %v2290_v1 }
 0x318   : > { %v2279_v50 = vpop.eup %2278 }
 0x319   : > { %v1433_v51 = vmul.f32 %v2279_v50, %v2271_v25  ;;  %2197 = vmatmul.mubr.msk.bf16.vlgmr.msra.gmra.mrb[36].mxu0 %vm1205_vm2, %v1436_v48 }
 0x31a   : > { %2207 = vmatpush3.bf16.msra.mxu0 %v1635_v49  ;;  %2208 = vmatprep.mubr.msk.bf16.mxu0 %vm2291_vm0, %v2290_v1 }
 0x31b   : > { %v1437_v52 = vpack.c.bf16 %v1433_v51, %v1433_v51  ;;  %2218 = vmatprep.subr.bf16.mxu0 %v2290_v1 }
 0x31d   : > { %2203 = vmatmul.mubr.msk.bf16.vlgmr.msra.gmra.mrb[36].mxu1 %vm1205_vm2, %v1437_v52 }
 0x31e   : > { %2214 = vmatprep.mubr.msk.bf16.mxu1 %vm2291_vm0, %v2290_v1  ;;  %2213 = vmatpush3.bf16.msra.mxu1 %v1681_v54  ;;  %v1999_v54 = vld [vmem:[%s2669_s11] ss:$0 sm:$0xff] }
 0x31f   : > { %2224 = vmatprep.subr.bf16.mxu1 %v2290_v1 }
 0x3e4   : > { %v1483_v56 = vpop.f32.mrb[32].mxu0 }
 0x3e5   : > { %v1627_v57 = vpack.c.bf16 %v1483_v56, %v1483_v56  ;;  %v2186_v58 = vpop.f32.mrb[33].mxu0 }
 0x3e6   : > { %v1486_v60 = vpop.f32.mrb[34].mxu0 }
 0x3e7   : > { %v2187_v62 = vpop.f32.mrb[35].mxu0  ;;  %2209 = vmatmul.mubr.msk.bf16.vlgmr.msra.gmra.mrb[40].mxu0 %vm1205_vm2, %v1627_v57 }
 0x3e8   : > { %v1529_v63 = vpop.f32.mrb[32].mxu1  ;;  %2219 = vmatpush3.bf16.msra.mxu0 %v1727_v59  ;;  %2220 = vmatprep.mubr.msk.bf16.mxu0 %vm2291_vm0, %v2290_v1 }
 0x3e9   : > { %v1628_v0 = vpack.c.bf16 %v1529_v63, %v1529_v63  ;;  %v2192_v2 = vpop.f32.mrb[33].mxu1 }
 0x3ea   : > { %v1532_v4 = vpop.f32.mrb[34].mxu1 }
 0x3eb   : > { %v2193_v5 = vpop.f32.mrb[35].mxu1  ;;  %2215 = vmatmul.mubr.msk.bf16.vlgmr.msra.gmra.mrb[40].mxu1 %vm1205_vm2, %v1628_v0 }
 0x3ec   : > { %v1575_v6 = vpop.f32.mrb[36].mxu0  ;;  %2225 = vmatpush3.bf16.msra.mxu1 %v1773_v3  ;;  %2226 = vmatprep.mubr.msk.bf16.mxu1 %vm2291_vm0, %v2290_v1 }
 0x3ed   : > { %v1629_v8 = vpack.c.bf16 %v1575_v6, %v1575_v6  ;;  %v2198_v9 = vpop.f32.mrb[37].mxu0 }
 0x3ee   : > { %v1578_v10 = vpop.f32.mrb[38].mxu0 }
 0x3ef   : > { %v2199_v11 = vpop.f32.mrb[39].mxu0  ;;  %2221 = vmatmul.mubr.msk.bf16.vlgmr.msra.gmra.mrb[44].mxu0 %vm1205_vm2, %v1629_v8 }
 0x3f0   : > { %v1621_v12 = vpop.f32.mrb[36].mxu1 }
 0x3f1   : > { %v1630_v13 = vpack.c.bf16 %v1621_v12, %v1621_v12  ;;  %v2204_v14 = vpop.f32.mrb[37].mxu1 }
 0x3f2   : > { %v1624_v15 = vpop.f32.mrb[38].mxu1 }
 0x3f3   : > { %v2205_v16 = vpop.f32.mrb[39].mxu1  ;;  %2227 = vmatmul.mubr.msk.bf16.vlgmr.msra.gmra.mrb[44].mxu1 %vm1205_vm2, %v1630_v13 }
 0x4ba   : > { %v1671_v17 = vpop.f32.mrb[40].mxu0 }
 0x4bb   : > { %v2210_v18 = vpop.f32.mrb[41].mxu0  ;;  %v1815_v1 = vsel %vm530_vm1, %v1671_v17, 0.0 }
 0x4bc   : > { %v1674_v19 = vpop.f32.mrb[42].mxu0 }
 0x4bd   : > { %v2211_v20 = vpop.f32.mrb[43].mxu0 }
 0x4be   : > { %v1717_v21 = vpop.f32.mrb[40].mxu1 }
 0x4bf   : > { %v1816_v22 = vsel %vm530_vm1, %v1717_v21, 0.0  ;;  %v2216_v23 = vpop.f32.mrb[41].mxu1 }
 0x4c0   : > { %v1817_v24 = vadd.f32 %v1816_v22, %v1815_v1  ;;  %v1720_v25 = vpop.f32.mrb[42].mxu1 }
 0x4c1   : > { %v2217_v26 = vpop.f32.mrb[43].mxu1 }
 0x4c2   : > { %v1763_v27 = vpop.f32.mrb[44].mxu0 }
 0x4c3   : > { %v1818_v28 = vsel %vm530_vm1, %v1763_v27, 0.0  ;;  %v2222_v29 = vpop.f32.mrb[45].mxu0 }
 0x4c4   : > { %v1819_v30 = vadd.f32 %v1818_v28, %v1817_v24  ;;  %v1766_v31 = vpop.f32.mrb[46].mxu0 }
 0x4c5   : > { %v2223_v32 = vpop.f32.mrb[47].mxu0 }
 0x4c6   : > { %v1809_v33 = vpop.f32.mrb[44].mxu1 }
 0x4c7   : > { %v1820_v35 = vsel %vm530_vm1, %v1809_v33, 0.0  ;;  %v2228_v36 = vpop.f32.mrb[45].mxu1 }
 0x4c8   : > { %v1821_v37 = vadd.f32 %v1820_v35, %v1819_v30  ;;  %v1812_v38 = vpop.f32.mrb[46].mxu1 }
 0x4c9   : > { %v2229_v40 = vpop.f32.mrb[47].mxu1 }
 0x4ca   : > { %v1828_v43 = vadd.f32 %v1997_v34, %v1821_v37 }
 0x4cc   : > { %v1830_v44 = vadd.f32 %v1829_v39, %v1828_v43 }
 0x4ce   : > { %v1833_v41 = vsel %vm530_vm1, %v1830_v44, 0.0 }
 0x4cf   : > { %1834 = vadd.xlane.f32.xlu0 %v1833_v41 }
 0x55c   : > { %v1835_v45 = vpop.xlane.xlu0 %1834 }
 0x55d   : > { %v1837_v42 = vmul.f32 0.03125, %v1835_v45 }
 0x55f   : > { %v1838_v46 = vsub.f32 %v1830_v44, %v1837_v42 }
 0x561   : > { %v1839_v47 = vmul.f32 %v1838_v46, %v1838_v46 }
 0x563   : > { %v1840_v48 = vsel %vm530_vm1, %v1839_v47, 0.0 }
 0x564   : > { %1841 = vadd.xlane.f32.xlu1 %v1840_v48 }
 0x5f1   : > { %v1842_v49 = vpop.xlane.xlu1 %1841 }
 0x5f2   : > { %v1843_v50 = vmul.f32 0.03125, %v1842_v49 }
 0x5f4   : > { %v1844_v51 = vadd.f32 1e-05, %v1843_v50 }
 0x5f6   : > { %2280 = vrsqrt.f32 %v1844_v51 }
 0x600   : > { %v2281_v52 = vpop.eup %2280 }
 0x601   : > { %v1846_v53 = vmul.f32 %v2281_v52, %v1838_v46 }
 0x603   : > { %v1853_v55 = vmul.f32 %v1998_v7, %v1846_v53 }
 0x605   : > { %v1860_v56 = vadd.f32 %v1999_v54, %v1853_v55 }
 0x607   : > { %v1861_v57 = vpack.c.bf16 %v1860_v56, %v1860_v56 }
 0x609   : > { %1863 = vst.msk [vmem:[%s425_s20] sm:$0xf] %vm1862_vm4, %v1861_v57 }
 0x60a PF: > { %s22_s21 = sadd.s32 1, %s2288_s21  }
 0x60b   : > { %p19_p4 = scmp.ge.s32.totalorder %s22_s21, 4  }
 0x60d   :  { %21 = sbr.rel (!%p19_p4) target bundleno = 1 (0x1), region = 101 }

// kernel: transformer_forward.8
= control target key start
LH: loop header
LB: loop body
LE: loop exit
PB: predicated region body
PF: predicated region fallthrough
CT: control target
= control target key end

     0   :  { %s2291_s17 = smov 0   ;;  %s2599_s0 = inlined_call_operand.vmem [shape: bf16[2,8,32], index: 0, kind: input, shape index: {}]   ;;  %s2600_s1 = inlined_call_operand.vmem [shape: bf16[4,32,8], index: 1, kind: input, shape index: {}]   ;;  %s2601_s2 = inlined_call_operand.vmem [shape: f32[4,1,8], index: 2, kind: input, shape index: {}]   ;;  %s2602_s3 = inlined_call_operand.vmem [shape: bf16[4,32,8], index: 3, kind: input, shape index: {}]   ;;  %s2603_s4 = inlined_call_operand.vmem [shape: f32[4,1,8], index: 4, kind: input, shape index: {}]   ;;  %s2604_s5 = inlined_call_operand.vmem [shape: bf16[4,32,8], index: 5, kind: input, shape index: {}]   ;;  %s2605_s6 = inlined_call_operand.vmem [shape: f32[4,1,8], index: 6, kind: input, shape index: {}]   ;;  %s2606_s7 = inlined_call_operand.vmem [shape: bf16[4,8,32], index: 7, kind: input, shape index: {}]   ;;  %s2607_s8 = inlined_call_operand.vmem [shape: f32[1,32], index: 8, kind: input, shape index: {}]   ;;  %s2608_s9 = inlined_call_operand.vmem [shape: f32[1,32], index: 9, kind: input, shape index: {}]   ;;  %s2609_s10 = inlined_call_operand.vmem [shape: f32[1,32], index: 10, kind: input, shape index: {}]   ;;  %s2610_s11 = inlined_call_operand.vmem [shape: bf16[2,8,32], index: 11, kind: output, shape index: {}]  }
   0x1 LB: > { %s1869_s18 = sadd.s32 4294967295, %s2227_s17   ;;  %p1873_p0 = scmp.ge.s32.totalorder %s2227_s17, 1  ;;  %s2227_s17 = sphi %s2291_s17, %s21_s17  }
   0x2   : > { %p336_p1 = scmp.lt.s32.totalorder %s2227_s17, 3 }
   0x4   : > { %p337_p2 = pnand %p1873_p0, %p336_p1 }
   0x5   : > { %v2179_v0 = vld [vmem:[%s2600_s1] sm:$0xff] (!%p337_p2)   ;;  %v2229_v1 = vmov (!%p337_p2), 0.0   ;;  %v2180_v2 = vld [vmem:[%s2600_s1 + $0x10] sm:$0xff] (!%p337_p2)   ;;  %v2181_v3 = vld [vmem:[%s2600_s1 + $0x8] sm:$0xff] (!%p337_p2)   ;;  %vm2230_vm0 = vmmov (!%p337_p2), 0   ;;  %p374_p3 = scmp.lt.s32.totalorder (!%p337_p2), %s1869_s18, 1 }
   0x6   : > { %340 = sbr.rel (%p337_p2) target bundleno = 1546 (0x60a), region = 64  ;;  %2001 = vmatprep.subr.bf16.mxu0 (!%p337_p2), %v2229_v1  ;;  %2009 = vmatprep.subr.bf16.mxu1 (!%p337_p2), %v2229_v1  ;;  %v2182_v4 = vld [vmem:[%s2600_s1 + $0x18] sm:$0xff] (!%p337_p2)   ;;  %vm485_vm1 = vcmask (!%p337_p2), 261120   ;;  %v2183_v5 = vld [vmem:[%s2600_s1 + $0x20] sm:$0xff] (!%p337_p2)   ;;  %v2184_v6 = vld [vmem:[%s2600_s1 + $0x30] sm:$0xff] (!%p337_p2)   ;;  %vm1157_vm2 = vcmask (!%p337_p2), 64512  }
   0x7   : > { %2002 = vmatpush3.bf16.msra.mxu0 (!%p337_p2), %v2179_v0  ;;  %2005 = vmatprep.mubr.msk.bf16.mxu0 (!%p337_p2), %vm2230_vm0, %v2229_v1  ;;  %v2185_v8 = vld [vmem:[%s2600_s1 + $0x28] sm:$0xff] (!%p337_p2)   ;;  %v2186_v9 = vld [vmem:[%s2600_s1 + $0x38] sm:$0xff] (!%p337_p2)   ;;  %v2187_v10 = vld [vmem:[%s2602_s3] sm:$0xff] (!%p337_p2)   ;;  %vm1397_vm3 = vcmask (!%p337_p2), 1043456   ;;  %vm1814_vm4 = vcmask (!%p337_p2), 257024  }
   0x8   : > { %2010 = vmatpush3.bf16.msra.mxu1 (!%p337_p2), %v2180_v2  ;;  %2003 = vmatprep.subr.bf16.mxu0 (!%p337_p2), %v2229_v1  ;;  %v2188_v11 = vld [vmem:[%s2602_s3 + $0x10] sm:$0xff] (!%p337_p2)   ;;  %v2189_v12 = vld [vmem:[%s2602_s3 + $0x8] sm:$0xff] (!%p337_p2)   ;;  %v2190_v13 = vld [vmem:[%s2602_s3 + $0x18] sm:$0xff] (!%p337_p2)  }
   0x9   : > { %2011 = vmatprep.subr.bf16.mxu1 (!%p337_p2), %v2229_v1  ;;  %2013 = vmatprep.mubr.msk.bf16.mxu1 (!%p337_p2), %vm2230_vm0, %v2229_v1  ;;  %v2191_v14 = vld [vmem:[%s2602_s3 + $0x20] sm:$0xff] (!%p337_p2)   ;;  %v2192_v15 = vld [vmem:[%s2602_s3 + $0x30] sm:$0xff] (!%p337_p2)   ;;  %v2193_v16 = vld [vmem:[%s2602_s3 + $0x28] sm:$0xff] (!%p337_p2)  }
   0xa   : > { %v2194_v17 = vld [vmem:[%s2602_s3 + $0x38] sm:$0xff] (!%p337_p2)   ;;  %v2195_v18 = vld [vmem:[%s2604_s5] sm:$0xff] (!%p337_p2)   ;;  %v2196_v19 = vld [vmem:[%s2604_s5 + $0x10] sm:$0xff] (!%p337_p2)  }
   0xb   : > { %2004 = vmatpush3.bf16.msra.mxu0 (!%p337_p2), %v2181_v3  ;;  %v2197_v20 = vld [vmem:[%s2604_s5 + $0x8] sm:$0xff] (!%p337_p2)   ;;  %v2198_v21 = vld [vmem:[%s2604_s5 + $0x18] sm:$0xff] (!%p337_p2)   ;;  %v2199_v22 = vld [vmem:[%s2604_s5 + $0x20] sm:$0xff] (!%p337_p2)  }
   0xc   : > { %2012 = vmatpush3.bf16.msra.mxu1 (!%p337_p2), %v2182_v4  ;;  %2017 = vmatprep.subr.bf16.mxu0 (!%p337_p2), %v2229_v1  ;;  %v2200_v23 = vld [vmem:[%s2604_s5 + $0x30] sm:$0xff] (!%p337_p2)   ;;  %v2201_v24 = vld [vmem:[%s2604_s5 + $0x28] sm:$0xff] (!%p337_p2)   ;;  %v2202_v25 = vld [vmem:[%s2604_s5 + $0x38] sm:$0xff] (!%p337_p2)  }
   0xd   : > { %s2612_s18 = smov (!%p374_p3, %s1869_s18), 1  ;;  %2025 = vmatprep.subr.bf16.mxu1 %v2229_v1  ;;  %v1892_v42 = vld [vmem:[%s2603_s4] ss:$0 sm:$0xff]  ;;  %v1893_v43 = vld [vmem:[%s2603_s4 + $0x1] ss:$0 sm:$0xff] }
   0xe   : > { %s1874_s27 = sshll.u32 %s2612_s18, 2  ;;  %v1876_v54 = vld [vmem:[%s2601_s2] ss:$0 sm:$0xff]  ;;  %v1877_v57 = vld [vmem:[%s2601_s2 + $0x1] ss:$0 sm:$0xff] }
   0xf   : > { %s377_s13 = scalar_lea.vmem %s2599_s0, %s1874_s27  ;;  %v1894_v60 = vld [vmem:[%s2603_s4 + $0x2] ss:$0 sm:$0xff]  ;;  %v1895_v62 = vld [vmem:[%s2603_s4 + $0x3] ss:$0 sm:$0xff]  ;;  %s381_s12 = scalar_lea.vmem %s2610_s11, %s1874_s27 }
  0x10   : > { %v2334_v7 = vld [vmem:[%s377_s13] sm:$0xf] }
  0x11   : > { %2006 = vmatmul.mubr.msk.bf16.vlgmr.msra.gmra.mrb[0].mxu0 %vm485_vm1, %v2334_v7  ;;  %2014 = vmatmul.mubr.msk.bf16.vlgmr.msra.gmra.mrb[0].mxu1 %vm485_vm1, %v2334_v7 }
  0x12   : > { %2018 = vmatpush3.bf16.msra.mxu0 %v2183_v5  ;;  %2026 = vmatpush3.bf16.msra.mxu1 %v2184_v6 }
  0x13   : > { %2019 = vmatprep.subr.bf16.mxu0 %v2229_v1  ;;  %2027 = vmatprep.subr.bf16.mxu1 %v2229_v1 }
  0x14   : > { %2021 = vmatprep.mubr.msk.bf16.mxu0 %vm2230_vm0, %v2229_v1  ;;  %2029 = vmatprep.mubr.msk.bf16.mxu1 %vm2230_vm0, %v2229_v1 }
  0x16   : > { %2020 = vmatpush3.bf16.msra.mxu0 %v2185_v8  ;;  %2028 = vmatpush3.bf16.msra.mxu1 %v2186_v9 }
  0x17   : > { %2033 = vmatprep.subr.bf16.mxu0 %v2229_v1  ;;  %2041 = vmatprep.subr.bf16.mxu1 %v2229_v1 }
  0x19   : > { %2022 = vmatmul.mubr.msk.bf16.vlgmr.msra.gmra.mrb[4].mxu0 %vm485_vm1, %v2334_v7  ;;  %2030 = vmatmul.mubr.msk.bf16.vlgmr.msra.gmra.mrb[4].mxu1 %vm485_vm1, %v2334_v7 }
  0x1a   : > { %2034 = vmatpush3.bf16.msra.mxu0 %v2187_v10  ;;  %2042 = vmatpush3.bf16.msra.mxu1 %v2188_v11 }
  0x1b   : > { %2035 = vmatprep.subr.bf16.mxu0 %v2229_v1  ;;  %2043 = vmatprep.subr.bf16.mxu1 %v2229_v1 }
  0x1c   : > { %2037 = vmatprep.mubr.msk.bf16.mxu0 %vm2230_vm0, %v2229_v1  ;;  %2045 = vmatprep.mubr.msk.bf16.mxu1 %vm2230_vm0, %v2229_v1 }
  0x1e   : > { %2036 = vmatpush3.bf16.msra.mxu0 %v2189_v12  ;;  %2044 = vmatpush3.bf16.msra.mxu1 %v2190_v13 }
  0x1f   : > { %2049 = vmatprep.subr.bf16.mxu0 %v2229_v1  ;;  %2057 = vmatprep.subr.bf16.mxu1 %v2229_v1 }
  0x21   : > { %2038 = vmatmul.mubr.msk.bf16.vlgmr.msra.gmra.mrb[8].mxu0 %vm485_vm1, %v2334_v7  ;;  %2046 = vmatmul.mubr.msk.bf16.vlgmr.msra.gmra.mrb[8].mxu1 %vm485_vm1, %v2334_v7 }
  0x22   : > { %2050 = vmatpush3.bf16.msra.mxu0 %v2191_v14  ;;  %2058 = vmatpush3.bf16.msra.mxu1 %v2192_v15  ;;  %v1878_v14 = vld [vmem:[%s2601_s2 + $0x2] ss:$0 sm:$0xff] }
  0x23   : > { %2051 = vmatprep.subr.bf16.mxu0 %v2229_v1  ;;  %2059 = vmatprep.subr.bf16.mxu1 %v2229_v1 }
  0x24   : > { %2053 = vmatprep.mubr.msk.bf16.mxu0 %vm2230_vm0, %v2229_v1  ;;  %2061 = vmatprep.mubr.msk.bf16.mxu1 %vm2230_vm0, %v2229_v1 }
  0x26   : > { %2052 = vmatpush3.bf16.msra.mxu0 %v2193_v16  ;;  %2060 = vmatpush3.bf16.msra.mxu1 %v2194_v17  ;;  %v1879_v17 = vld [vmem:[%s2601_s2 + $0x3] ss:$0 sm:$0xff] }
  0x27   : > { %2065 = vmatprep.subr.bf16.mxu0 %v2229_v1  ;;  %2073 = vmatprep.subr.bf16.mxu1 %v2229_v1 }
  0x29   : > { %2054 = vmatmul.mubr.msk.bf16.vlgmr.msra.gmra.mrb[12].mxu0 %vm485_vm1, %v2334_v7  ;;  %2062 = vmatmul.mubr.msk.bf16.vlgmr.msra.gmra.mrb[12].mxu1 %vm485_vm1, %v2334_v7 }
  0x2a   : > { %2066 = vmatpush3.bf16.msra.mxu0 %v2195_v18  ;;  %2069 = vmatprep.mubr.msk.bf16.mxu0 %vm2230_vm0, %v2229_v1 }
  0x2b   : > { %2067 = vmatprep.subr.bf16.mxu0 %v2229_v1  ;;  %2077 = vmatprep.mubr.msk.bf16.mxu1 %vm2230_vm0, %v2229_v1 }
  0x2c   : > { %2074 = vmatpush3.bf16.msra.mxu1 %v2196_v19 }
  0x2d   : > { %2075 = vmatprep.subr.bf16.mxu1 %v2229_v1 }
  0x2e   : > { %2068 = vmatpush3.bf16.msra.mxu0 %v2197_v20 }
  0x2f   : > { %2081 = vmatprep.subr.bf16.mxu0 %v2229_v1 }
  0x30   : > { %2076 = vmatpush3.bf16.msra.mxu1 %v2198_v21 }
  0x31   : > { %2070 = vmatmul.mubr.msk.bf16.vlgmr.msra.gmra.mrb[16].mxu0 %vm485_vm1, %v2334_v7  ;;  %2089 = vmatprep.subr.bf16.mxu1 %v2229_v1 }
  0x32   : > { %2085 = vmatprep.mubr.msk.bf16.mxu0 %vm2230_vm0, %v2229_v1  ;;  %2082 = vmatpush3.bf16.msra.mxu0 %v2199_v22 }
  0x33   : > { %2078 = vmatmul.mubr.msk.bf16.vlgmr.msra.gmra.mrb[16].mxu1 %vm485_vm1, %v2334_v7  ;;  %2083 = vmatprep.subr.bf16.mxu0 %v2229_v1 }
  0x34   : > { %2090 = vmatpush3.bf16.msra.mxu1 %v2200_v23  ;;  %2093 = vmatprep.mubr.msk.bf16.mxu1 %vm2230_vm0, %v2229_v1 }
  0x35   : > { %2091 = vmatprep.subr.bf16.mxu1 %v2229_v1 }
  0x36   : > { %2084 = vmatpush3.bf16.msra.mxu0 %v2201_v24  ;;  %v1908_v24 = vld [vmem:[%s2605_s6] ss:$0 sm:$0xff] }
  0x37   : > { %2097 = vmatprep.subr.bf16.mxu0 %v2229_v1 }
  0x38   : > { %2092 = vmatpush3.bf16.msra.mxu1 %v2202_v25 }
  0x39   : > { %2103 = vmatprep.subr.bf16.mxu1 %v2229_v1  ;;  %2086 = vmatmul.mubr.msk.bf16.vlgmr.msra.gmra.mrb[20].mxu0 %vm485_vm1, %v2334_v7 }
  0x3a   : > { %2099 = vmatprep.mubr.msk.bf16.mxu0 %vm2230_vm0, %v2229_v1 }
  0x3b   : > { %2094 = vmatmul.mubr.msk.bf16.vlgmr.msra.gmra.mrb[20].mxu1 %vm485_vm1, %v2334_v7 }
  0x3c   : > { %2105 = vmatprep.mubr.msk.bf16.mxu1 %vm2230_vm0, %v2229_v1 }
  0xe4   : > { %v523_v26 = vpop.f32.mrb[0].mxu0  ;;  %v575_v28 = vpop.f32.mrb[0].mxu1 }
  0xe5   : > { %v2007_v27 = vpop.f32.mrb[1].mxu0  ;;  %v2015_v30 = vpop.f32.mrb[1].mxu1  ;;  %v524_v61 = vadd.f32 %v1876_v54, %v523_v26  ;;  %v576_v63 = vadd.f32 %v1877_v57, %v575_v28  ;;  %v1909_v26 = vld [vmem:[%s2605_s6 + $0x1] ss:$0 sm:$0xff] }
  0xe6   : > { %v526_v29 = vpop.f32.mrb[2].mxu0  ;;  %v578_v32 = vpop.f32.mrb[2].mxu1 }
  0xe7   : > { %v2008_v31 = vpop.f32.mrb[3].mxu0  ;;  %v2016_v33 = vpop.f32.mrb[3].mxu1  ;;  %v1149_v9 = vpack.c.bf16 %v524_v61, %v524_v61  ;;  %v1150_v13 = vpack.c.bf16 %v576_v63, %v576_v63 }
  0xec   : > { %v627_v34 = vpop.f32.mrb[4].mxu0  ;;  %v679_v36 = vpop.f32.mrb[4].mxu1 }
  0xed   : > { %v2023_v35 = vpop.f32.mrb[5].mxu0  ;;  %v2031_v38 = vpop.f32.mrb[5].mxu1  ;;  %v628_v20 = vadd.f32 %v1878_v14, %v627_v34  ;;  %v680_v21 = vadd.f32 %v1879_v17, %v679_v36 }
  0xee   : > { %v630_v37 = vpop.f32.mrb[6].mxu0  ;;  %v682_v40 = vpop.f32.mrb[6].mxu1 }
  0xef   : > { %v2024_v39 = vpop.f32.mrb[7].mxu0  ;;  %v2032_v41 = vpop.f32.mrb[7].mxu1  ;;  %v1151_v22 = vpack.c.bf16 %v628_v20, %v628_v20  ;;  %v1152_v23 = vpack.c.bf16 %v680_v21, %v680_v21 }
  0xf4   : > { %v755_v44 = vpop.f32.mrb[8].mxu0  ;;  %v807_v46 = vpop.f32.mrb[8].mxu1 }
  0xf5   : > { %v756_v45 = vadd.f32 %v1892_v42, %v755_v44  ;;  %v2039_v47 = vpop.f32.mrb[9].mxu0  ;;  %v808_v48 = vadd.f32 %v1893_v43, %v807_v46  ;;  %v2047_v50 = vpop.f32.mrb[9].mxu1 }
  0xf6   : > { %v758_v49 = vpop.f32.mrb[10].mxu0  ;;  %v810_v53 = vpop.f32.mrb[10].mxu1 }
  0xf7   : > { %v1153_v51 = vpack.c.bf16 %v756_v45, %v756_v45  ;;  %v2040_v52 = vpop.f32.mrb[11].mxu0  ;;  %v1154_v55 = vpack.c.bf16 %v808_v48, %v808_v48  ;;  %v2048_v56 = vpop.f32.mrb[11].mxu1 }
  0xf9   : > { %v1162_v58 = vsel %vm1157_vm2, %v1153_v51, 0  ;;  %v1208_v59 = vsel %vm1157_vm2, %v1154_v55, 0 }
  0xfa   : > { %2098 = vmatpush3.bf16.xpose.msra.mxu0 %v1162_v58  ;;  %2104 = vmatpush3.bf16.xpose.msra.mxu1 %v1208_v59 }
  0xfb   : > { %2109 = vmatprep.subr.bf16.mxu0 %v2229_v1  ;;  %2115 = vmatprep.subr.bf16.mxu1 %v2229_v1 }
  0xfc   : > { %v859_v0 = vpop.f32.mrb[12].mxu0  ;;  %v911_v3 = vpop.f32.mrb[12].mxu1 }
  0xfd   : > { %v860_v2 = vadd.f32 %v1894_v60, %v859_v0  ;;  %v2055_v4 = vpop.f32.mrb[13].mxu0  ;;  %v912_v5 = vadd.f32 %v1895_v62, %v911_v3  ;;  %v2063_v8 = vpop.f32.mrb[13].mxu1 }
  0xfe   : > { %v862_v6 = vpop.f32.mrb[14].mxu0  ;;  %v914_v12 = vpop.f32.mrb[14].mxu1 }
  0xff   : > { %v1155_v10 = vpack.c.bf16 %v860_v2, %v860_v2  ;;  %v2056_v11 = vpop.f32.mrb[15].mxu0  ;;  %v1156_v15 = vpack.c.bf16 %v912_v5, %v912_v5  ;;  %v2064_v16 = vpop.f32.mrb[15].mxu1 }
 0x101   : > { %v1254_v18 = vsel %vm1157_vm2, %v1155_v10, 0  ;;  %2100 = vmatmul.mubr.msk.bf16.vlgmr.msra.gmra.mrb[24].mxu0 %vm1157_vm2, %v1149_v9  ;;  %v1300_v19 = vsel %vm1157_vm2, %v1156_v15, 0  ;;  %2106 = vmatmul.mubr.msk.bf16.vlgmr.msra.gmra.mrb[24].mxu1 %vm1157_vm2, %v1150_v13 }
 0x102   : > { %2110 = vmatpush3.bf16.xpose.msra.mxu0 %v1254_v18  ;;  %2116 = vmatpush3.bf16.xpose.msra.mxu1 %v1300_v19 }
 0x103   : > { %2111 = vmatprep.mubr.msk.bf16.mxu0 %vm2230_vm0, %v2229_v1  ;;  %2117 = vmatprep.mubr.msk.bf16.mxu1 %vm2230_vm0, %v2229_v1 }
 0x104   : > { %2121 = vmatprep.subr.bf16.mxu0 %v2229_v1  ;;  %2127 = vmatprep.subr.bf16.mxu1 %v2229_v1  ;;  %v987_v25 = vpop.f32.mrb[16].mxu0 }
 0x105   : > { %v988_v27 = vadd.f32 %v1908_v24, %v987_v25  ;;  %v2071_v28 = vpop.f32.mrb[17].mxu0 }
 0x106   : > { %v990_v29 = vpop.f32.mrb[18].mxu0  ;;  %v1039_v30 = vpop.f32.mrb[16].mxu1  ;;  %v1910_v28 = vld [vmem:[%s2605_s6 + $0x2] ss:$0 sm:$0xff] }
 0x107   : > { %v1390_v31 = vpack.c.bf16 %v988_v27, %v988_v27  ;;  %v2072_v32 = vpop.f32.mrb[19].mxu0  ;;  %v1040_v33 = vadd.f32 %v1909_v26, %v1039_v30  ;;  %v2079_v34 = vpop.f32.mrb[17].mxu1 }
 0x108   : > { %v1042_v35 = vpop.f32.mrb[18].mxu1 }
 0x109   : > { %2112 = vmatmul.mubr.msk.bf16.vlgmr.msra.gmra.mrb[28].mxu0 %vm1157_vm2, %v1151_v22  ;;  %2118 = vmatmul.mubr.msk.bf16.vlgmr.msra.gmra.mrb[28].mxu1 %vm1157_vm2, %v1152_v23  ;;  %v1399_v36 = vsel %vm1397_vm3, %v1390_v31, 0  ;;  %v1391_v37 = vpack.c.bf16 %v1040_v33, %v1040_v33  ;;  %v2080_v38 = vpop.f32.mrb[19].mxu1  ;;  %v1911_v31 = vld [vmem:[%s2605_s6 + $0x3] ss:$0 sm:$0xff] }
 0x10a   : > { %2123 = vmatprep.mubr.msk.bf16.mxu0 %vm2230_vm0, %v2229_v1  ;;  %2129 = vmatprep.mubr.msk.bf16.mxu1 %vm2230_vm0, %v2229_v1 }
 0x10b   : > { %2122 = vmatpush3.bf16.msra.mxu0 %v1399_v36  ;;  %v1445_v39 = vsel %vm1397_vm3, %v1391_v37, 0 }
 0x10c   : > { %2133 = vmatprep.subr.bf16.mxu0 %v2229_v1  ;;  %2128 = vmatpush3.bf16.msra.mxu1 %v1445_v39  ;;  %v2513_v40 = vpop.f32.mrb[20].mxu0 }
 0x10d   : > { %2139 = vmatprep.subr.bf16.mxu1 %v2229_v1  ;;  %v2087_v42 = vpop.f32.mrb[21].mxu0  ;;  %v1092_v29 = vadd.f32 %v1910_v28, %v2513_v40 }
 0x10e   : > { %v2515_v41 = vpop.f32.mrb[20].mxu1  ;;  %v1094_v44 = vpop.f32.mrb[22].mxu0 }
 0x10f   : > { %v2095_v43 = vpop.f32.mrb[21].mxu1  ;;  %v2088_v46 = vpop.f32.mrb[23].mxu0  ;;  %v1392_v33 = vpack.c.bf16 %v1092_v29, %v1092_v29  ;;  %v1144_v34 = vadd.f32 %v1911_v31, %v2515_v41  ;;  %v444_v41 = vld [vmem:[%s2606_s7] sm:$0xf] }
 0x110   : > { %v1146_v45 = vpop.f32.mrb[22].mxu1 }
 0x111   : > { %v2096_v47 = vpop.f32.mrb[23].mxu1  ;;  %v1491_v39 = vsel %vm1397_vm3, %v1392_v33, 0  ;;  %v1393_v42 = vpack.c.bf16 %v1144_v34, %v1144_v34  ;;  %v1936_v33 = vld [vmem:[%s2607_s8] ss:$0 sm:$0xff] }
 0x113   : > { %v1537_v45 = vsel %vm1397_vm3, %v1393_v42, 0 }
 0x1d4   : > { %v1198_v48 = vpop.f32.mrb[24].mxu0  ;;  %v1244_v49 = vpop.f32.mrb[24].mxu1 }
 0x1d5   : > { %v2101_v50 = vpop.f32.mrb[25].mxu0  ;;  %v1342_v51 = vsel %vm1157_vm2, %v1198_v48, -inf  ;;  %v2107_v52 = vpop.f32.mrb[25].mxu1  ;;  %v1345_v57 = vsel %vm1157_vm2, %v1244_v49, -inf }
 0x1d6   : > { %1343 = vmax.xlane.f32.xlu0 %v1342_v51  ;;  %v1201_v53 = vpop.f32.mrb[26].mxu0  ;;  %v1247_v54 = vpop.f32.mrb[26].mxu1  ;;  %v445_v52 = vld [vmem:[%s2606_s7 + $0x4] sm:$0xf] }
 0x1d7   : > { %v2102_v55 = vpop.f32.mrb[27].mxu0  ;;  %v2108_v56 = vpop.f32.mrb[27].mxu1  ;;  %v1633_v53 = vsel %vm1397_vm3, %v445_v52, 0  ;;  %v446_v54 = vld [vmem:[%s2606_s7 + $0x8] sm:$0xf] }
 0x1da   : > { %1346 = vmax.xlane.f32.xlu0 %v1345_v57 }
 0x1dc   : > { %v1290_v58 = vpop.f32.mrb[28].mxu0  ;;  %v1336_v59 = vpop.f32.mrb[28].mxu1 }
 0x1dd   : > { %v2113_v60 = vpop.f32.mrb[29].mxu0  ;;  %v1348_v61 = vsel %vm1157_vm2, %v1290_v58, -inf  ;;  %v2119_v62 = vpop.f32.mrb[29].mxu1  ;;  %v1351_v4 = vsel %vm1157_vm2, %v1336_v59, -inf }
 0x1de   : > { %1349 = vmax.xlane.f32.xlu1 %v1348_v61  ;;  %v1293_v63 = vpop.f32.mrb[30].mxu0  ;;  %v1339_v0 = vpop.f32.mrb[30].mxu1  ;;  %v447_v60 = vld [vmem:[%s2606_s7 + $0xc] sm:$0xf] }
 0x1df   : > { %v2114_v2 = vpop.f32.mrb[31].mxu0  ;;  %v2120_v3 = vpop.f32.mrb[31].mxu1 }
 0x1e0   : > { %v1725_v2 = vsel %vm1397_vm3, %v447_v60, 0 }
 0x1e2   : > { %1352 = vmax.xlane.f32.xlu1 %v1351_v4 }
 0x263   : > { %v1344_v5 = vpop.xlane.xlu0 %1343 }
 0x264   : > { %v1354_v6 = vsub.f32 %v1198_v48, %v1344_v5  ;;  %v1587_v48 = vsel %vm1397_vm3, %v444_v41, 0 }
 0x266   : > { %v1358_v8 = vmul.f32 1.442695, %v1354_v6 }
 0x267   : > { %v1347_v9 = vpop.xlane.xlu0 %1346 }
 0x268   : > { %2203 = vpow2.f32 %v1358_v8  ;;  %v1355_v10 = vsub.f32 %v1244_v49, %v1347_v9 }
 0x26a   : > { %v1360_v11 = vmul.f32 1.442695, %v1355_v10 }
 0x26b   : > { %v1350_v12 = vpop.xlane.xlu1 %1349 }
 0x26c   : > { %2205 = vpow2.f32 %v1360_v11  ;;  %v1356_v13 = vsub.f32 %v1290_v58, %v1350_v12  ;;  %v1679_v58 = vsel %vm1397_vm3, %v446_v54, 0 }
 0x26e   : > { %v1362_v14 = vmul.f32 1.442695, %v1356_v13 }
 0x26f   : > { %v1353_v15 = vpop.xlane.xlu1 %1352 }
 0x270   : > { %2207 = vpow2.f32 %v1362_v14  ;;  %v1357_v16 = vsub.f32 %v1336_v59, %v1353_v15 }
 0x272   : > { %v2204_v17 = vpop.eup %2203  ;;  %v1364_v18 = vmul.f32 1.442695, %v1357_v16 }
 0x273   : > { %v1366_v19 = vsel %vm1157_vm2, %v2204_v17, 0.0 }
 0x274   : > { %2209 = vpow2.f32 %v1364_v18  ;;  %1367 = vadd.xlane.f32.xlu0 %v1366_v19 }
 0x276   : > { %v2206_v20 = vpop.eup %2205 }
 0x277   : > { %v1369_v21 = vsel %vm1157_vm2, %v2206_v20, 0.0 }
 0x278   : > { %1370 = vadd.xlane.f32.xlu1 %v1369_v21 }
 0x27a   : > { %v2208_v22 = vpop.eup %2207 }
 0x27b   : > { %v1372_v23 = vsel %vm1157_vm2, %v2208_v22, 0.0 }
 0x27c   : > { %1373 = vadd.xlane.f32.xlu0 %v1372_v23 }
 0x27e   : > { %v2210_v24 = vpop.eup %2209 }
 0x27f   : > { %v1375_v25 = vsel %vm1157_vm2, %v2210_v24, 0.0 }
 0x280   : > { %1376 = vadd.xlane.f32.xlu1 %v1375_v25 }
 0x301   : > { %v1368_v26 = vpop.xlane.xlu0 %1367 }
 0x302   : > { %2211 = vrcp.f32 %v1368_v26 }
 0x305   : > { %v1371_v27 = vpop.xlane.xlu1 %1370 }
 0x306   : > { %2213 = vrcp.f32 %v1371_v27 }
 0x309   : > { %v1374_v30 = vpop.xlane.xlu0 %1373 }
 0x30a   : > { %2215 = vrcp.f32 %v1374_v30 }
 0x30c   : > { %v2212_v32 = vpop.eup %2211 }
 0x30d   : > { %v1382_v35 = vmul.f32 %v2212_v32, %v2204_v17  ;;  %v1377_v36 = vpop.xlane.xlu1 %1376 }
 0x30e   : > { %2217 = vrcp.f32 %v1377_v36 }
 0x30f   : > { %v1386_v37 = vpack.c.bf16 %v1382_v35, %v1382_v35 }
 0x310   : > { %v2214_v38 = vpop.eup %2213 }
 0x311   : > { %v1383_v43 = vmul.f32 %v2214_v38, %v2206_v20  ;;  %2124 = vmatmul.mubr.msk.bf16.vlgmr.msra.gmra.mrb[32].mxu0 %vm1157_vm2, %v1386_v37  ;;  %v1781_v38 = vunpack.c.l.bf16 %v2334_v7  ;;  %v1937_v7 = vld [vmem:[%s2608_s9] ss:$0 sm:$0xff] }
 0x312   : > { %2134 = vmatpush3.bf16.msra.mxu0 %v1491_v39  ;;  %2135 = vmatprep.mubr.msk.bf16.mxu0 %vm2230_vm0, %v2229_v1 }
 0x313   : > { %v1387_v40 = vpack.c.bf16 %v1383_v43, %v1383_v43  ;;  %2145 = vmatprep.subr.bf16.mxu0 %v2229_v1 }
 0x314   : > { %v2216_v44 = vpop.eup %2215 }
 0x315   : > { %v1384_v46 = vmul.f32 %v2216_v44, %v2208_v22  ;;  %2130 = vmatmul.mubr.msk.bf16.vlgmr.msra.gmra.mrb[32].mxu1 %vm1157_vm2, %v1387_v40 }
 0x316   : > { %2140 = vmatpush3.bf16.msra.mxu1 %v1537_v45  ;;  %2141 = vmatprep.mubr.msk.bf16.mxu1 %vm2230_vm0, %v2229_v1 }
 0x317   : > { %v1388_v47 = vpack.c.bf16 %v1384_v46, %v1384_v46  ;;  %2151 = vmatprep.subr.bf16.mxu1 %v2229_v1 }
 0x318   : > { %v2218_v49 = vpop.eup %2217 }
 0x319   : > { %v1385_v50 = vmul.f32 %v2218_v49, %v2210_v24  ;;  %2136 = vmatmul.mubr.msk.bf16.vlgmr.msra.gmra.mrb[36].mxu0 %vm1157_vm2, %v1388_v47 }
 0x31a   : > { %2146 = vmatpush3.bf16.msra.mxu0 %v1587_v48  ;;  %2147 = vmatprep.mubr.msk.bf16.mxu0 %vm2230_vm0, %v2229_v1 }
 0x31b   : > { %v1389_v51 = vpack.c.bf16 %v1385_v50, %v1385_v50  ;;  %2157 = vmatprep.subr.bf16.mxu0 %v2229_v1 }
 0x31d   : > { %2142 = vmatmul.mubr.msk.bf16.vlgmr.msra.gmra.mrb[36].mxu1 %vm1157_vm2, %v1389_v51 }
 0x31e   : > { %2153 = vmatprep.mubr.msk.bf16.mxu1 %vm2230_vm0, %v2229_v1  ;;  %2152 = vmatpush3.bf16.msra.mxu1 %v1633_v53  ;;  %v1938_v53 = vld [vmem:[%s2609_s10] ss:$0 sm:$0xff] }
 0x31f   : > { %2163 = vmatprep.subr.bf16.mxu1 %v2229_v1 }
 0x3e4   : > { %v1435_v55 = vpop.f32.mrb[32].mxu0 }
 0x3e5   : > { %v1579_v56 = vpack.c.bf16 %v1435_v55, %v1435_v55  ;;  %v2125_v57 = vpop.f32.mrb[33].mxu0 }
 0x3e6   : > { %v1438_v59 = vpop.f32.mrb[34].mxu0 }
 0x3e7   : > { %v2126_v61 = vpop.f32.mrb[35].mxu0  ;;  %2148 = vmatmul.mubr.msk.bf16.vlgmr.msra.gmra.mrb[40].mxu0 %vm1157_vm2, %v1579_v56 }
 0x3e8   : > { %v1481_v62 = vpop.f32.mrb[32].mxu1  ;;  %2158 = vmatpush3.bf16.msra.mxu0 %v1679_v58  ;;  %2159 = vmatprep.mubr.msk.bf16.mxu0 %vm2230_vm0, %v2229_v1 }
 0x3e9   : > { %v1580_v63 = vpack.c.bf16 %v1481_v62, %v1481_v62  ;;  %v2131_v0 = vpop.f32.mrb[33].mxu1 }
 0x3ea   : > { %v1484_v3 = vpop.f32.mrb[34].mxu1 }
 0x3eb   : > { %v2132_v4 = vpop.f32.mrb[35].mxu1  ;;  %2154 = vmatmul.mubr.msk.bf16.vlgmr.msra.gmra.mrb[40].mxu1 %vm1157_vm2, %v1580_v63 }
 0x3ec   : > { %v1527_v5 = vpop.f32.mrb[36].mxu0  ;;  %2164 = vmatpush3.bf16.msra.mxu1 %v1725_v2  ;;  %2165 = vmatprep.mubr.msk.bf16.mxu1 %vm2230_vm0, %v2229_v1 }
 0x3ed   : > { %v1581_v6 = vpack.c.bf16 %v1527_v5, %v1527_v5  ;;  %v2137_v8 = vpop.f32.mrb[37].mxu0 }
 0x3ee   : > { %v1530_v9 = vpop.f32.mrb[38].mxu0 }
 0x3ef   : > { %v2138_v10 = vpop.f32.mrb[39].mxu0  ;;  %2160 = vmatmul.mubr.msk.bf16.vlgmr.msra.gmra.mrb[44].mxu0 %vm1157_vm2, %v1581_v6 }
 0x3f0   : > { %v1573_v11 = vpop.f32.mrb[36].mxu1 }
 0x3f1   : > { %v1582_v12 = vpack.c.bf16 %v1573_v11, %v1573_v11  ;;  %v2143_v13 = vpop.f32.mrb[37].mxu1 }
 0x3f2   : > { %v1576_v14 = vpop.f32.mrb[38].mxu1 }
 0x3f3   : > { %v2144_v15 = vpop.f32.mrb[39].mxu1  ;;  %2166 = vmatmul.mubr.msk.bf16.vlgmr.msra.gmra.mrb[44].mxu1 %vm1157_vm2, %v1582_v12 }
 0x4ba   : > { %v1623_v16 = vpop.f32.mrb[40].mxu0 }
 0x4bb   : > { %v2149_v17 = vpop.f32.mrb[41].mxu0  ;;  %v1767_v1 = vsel %vm485_vm1, %v1623_v16, 0.0 }
 0x4bc   : > { %v1626_v18 = vpop.f32.mrb[42].mxu0 }
 0x4bd   : > { %v2150_v19 = vpop.f32.mrb[43].mxu0 }
 0x4be   : > { %v1669_v20 = vpop.f32.mrb[40].mxu1 }
 0x4bf   : > { %v1768_v21 = vsel %vm485_vm1, %v1669_v20, 0.0  ;;  %v2155_v22 = vpop.f32.mrb[41].mxu1 }
 0x4c0   : > { %v1769_v23 = vadd.f32 %v1768_v21, %v1767_v1  ;;  %v1672_v24 = vpop.f32.mrb[42].mxu1 }
 0x4c1   : > { %v2156_v25 = vpop.f32.mrb[43].mxu1 }
 0x4c2   : > { %v1715_v26 = vpop.f32.mrb[44].mxu0 }
 0x4c3   : > { %v1770_v27 = vsel %vm485_vm1, %v1715_v26, 0.0  ;;  %v2161_v28 = vpop.f32.mrb[45].mxu0 }
 0x4c4   : > { %v1771_v29 = vadd.f32 %v1770_v27, %v1769_v23  ;;  %v1718_v30 = vpop.f32.mrb[46].mxu0 }
 0x4c5   : > { %v2162_v31 = vpop.f32.mrb[47].mxu0 }
 0x4c6   : > { %v1761_v32 = vpop.f32.mrb[44].mxu1 }
 0x4c7   : > { %v1772_v34 = vsel %vm485_vm1, %v1761_v32, 0.0  ;;  %v2167_v35 = vpop.f32.mrb[45].mxu1 }
 0x4c8   : > { %v1773_v36 = vadd.f32 %v1772_v34, %v1771_v29  ;;  %v1764_v37 = vpop.f32.mrb[46].mxu1 }
 0x4c9   : > { %v2168_v39 = vpop.f32.mrb[47].mxu1 }
 0x4ca   : > { %v1780_v42 = vadd.f32 %v1936_v33, %v1773_v36 }
 0x4cc   : > { %v1782_v43 = vadd.f32 %v1781_v38, %v1780_v42 }
 0x4ce   : > { %v1785_v40 = vsel %vm485_vm1, %v1782_v43, 0.0 }
 0x4cf   : > { %1786 = vadd.xlane.f32.xlu0 %v1785_v40 }
 0x55c   : > { %v1787_v44 = vpop.xlane.xlu0 %1786 }
 0x55d   : > { %v1789_v41 = vmul.f32 0.03125, %v1787_v44 }
 0x55f   : > { %v1790_v45 = vsub.f32 %v1782_v43, %v1789_v41 }
 0x561   : > { %v1791_v46 = vmul.f32 %v1790_v45, %v1790_v45 }
 0x563   : > { %v1792_v47 = vsel %vm485_vm1, %v1791_v46, 0.0 }
 0x564   : > { %1793 = vadd.xlane.f32.xlu1 %v1792_v47 }
 0x5f1   : > { %v1794_v48 = vpop.xlane.xlu1 %1793 }
 0x5f2   : > { %v1795_v49 = vmul.f32 0.03125, %v1794_v48 }
 0x5f4   : > { %v1796_v50 = vadd.f32 1e-05, %v1795_v49 }
 0x5f6   : > { %2219 = vrsqrt.f32 %v1796_v50 }
 0x600   : > { %v2220_v51 = vpop.eup %2219 }
 0x601   : > { %v1798_v52 = vmul.f32 %v2220_v51, %v1790_v45 }
 0x603   : > { %v1805_v54 = vmul.f32 %v1937_v7, %v1798_v52 }
 0x605   : > { %v1812_v55 = vadd.f32 %v1938_v53, %v1805_v54 }
 0x607   : > { %v1813_v56 = vpack.c.bf16 %v1812_v55, %v1812_v55 }
 0x609   : > { %1815 = vst.msk [vmem:[%s381_s12] sm:$0xf] %vm1814_vm4, %v1813_v56 }
 0x60a PF: > { %s21_s17 = sadd.s32 1, %s2227_s17  }
 0x60b   : > { %p18_p4 = scmp.ge.s32.totalorder %s21_s17, 4  }
 0x60d   :  { %20 = sbr.rel (!%p18_p4) target bundleno = 1 (0x1), region = 94 }

</bundles_post_ra>
